<compile_context>
chip_gen: v5e
topology: v5e:2x2
jax: 0.10.0
libtpu: 0.0.40
codegen_flags: <defaults>
</compile_context>

<pallas_src>
import functools

import jax
import jax.numpy as jnp
from jax.experimental import pallas as pl
from jax.experimental.pallas import tpu as pltpu

_SUBLANE = 8
_LANE = 128
_VMEM_SPEC = functools.partial(pl.BlockSpec, memory_space=pltpu.MemorySpace.VMEM)


# ---------------------------------------------------------------------------
# Fused Pallas kernel: acoustic base + LSTM (last valid hidden) + task-0 head
# ---------------------------------------------------------------------------
def _fused_forward_kernel(ac_ref, embs_ref, len_ref,
                          acw1_ref, acb1_ref, acw2_ref, acb2_ref,
                          wih_ref, whh_ref, lstm_b_ref,
                          fc1a_ref, fc1t_ref, fc1b_ref,
                          fc2_ref, fc2b_ref,
                          out_ref):
    # ---- AcousticOnlyModel: mean over time -> fc1 -> tanh -> fc2 -> tanh ----
    x = jnp.mean(ac_ref[...].astype(jnp.float32), axis=1)                    # (B, A)
    h1 = jnp.tanh(jnp.dot(x, acw1_ref[...],
                          preferred_element_type=jnp.float32) + acb1_ref[...])
    base = jnp.tanh(jnp.dot(h1, acw2_ref[...],
                            preferred_element_type=jnp.float32) + acb2_ref[...])

    # ---- text LSTM: hoisted input projection + fully-unrolled recurrence ----
    T, B, E = embs_ref.shape
    H = whh_ref.shape[0]

    # One MXU call over all T*B rows (no recurrent dependence), bias folded in.
    embs_flat = embs_ref[...].reshape(T * B, E)
    x_proj = (jnp.dot(embs_flat, wih_ref[...], preferred_element_type=jnp.float32)
              + lstm_b_ref[...]).reshape(T, B, 4 * H)

    lens = len_ref[...]                                                      # (B, 1) int32
    whh = whh_ref[...]                                                       # (H, 4H)
    h = jnp.zeros((B, H), jnp.float32)
    c = jnp.zeros((B, H), jnp.float32)

    # T is small and static -> full trace-time unroll; only h @ W_hh^T is serial.
    for t in range(T):
        gates = x_proj[t] + jnp.dot(h, whh, preferred_element_type=jnp.float32)
        i_g = jax.nn.sigmoid(gates[:, 0 * H:1 * H])
        f_g = jax.nn.sigmoid(gates[:, 1 * H:2 * H])
        g_g = jnp.tanh(gates[:, 2 * H:3 * H])
        o_g = jax.nn.sigmoid(gates[:, 3 * H:4 * H])
        c_new = f_g * c + i_g * g_g
        h_new = o_g * jnp.tanh(c_new)
        valid = lens > t                                                     # (B, 1) bool
        h = jnp.where(valid, h_new, h)                                       # last VALID hidden
        c = jnp.where(valid, c_new, c)

    # ---- TextPlusPredictionLayer head: fc1(concat) as split matmuls -> tanh -> fc2 ----
    pen = jnp.tanh(jnp.dot(base, fc1a_ref[...], preferred_element_type=jnp.float32)
                   + jnp.dot(h, fc1t_ref[...], preferred_element_type=jnp.float32)
                   + fc1b_ref[...])
    out_ref[...] = (jnp.dot(pen, fc2_ref[...], preferred_element_type=jnp.float32)
                    + fc2b_ref[...])


def fused_forward(ac, embs_tbe, lens_b1,
                  ac_w1_t, ac_b1, ac_w2_t, ac_b2,
                  wih_t, whh_t, lstm_b,
                  fc1a_t, fc1t_t, fc1_b,
                  fc2_t, fc2_b):
    B_pad = ac.shape[0]
    out_pad = fc2_t.shape[1]
    operands = (ac, embs_tbe, lens_b1,
                ac_w1_t, ac_b1, ac_w2_t, ac_b2,
                wih_t, whh_t, lstm_b,
                fc1a_t, fc1t_t, fc1_b,
                fc2_t, fc2_b)
    return pl.pallas_call(
        _fused_forward_kernel,
        out_shape=jax.ShapeDtypeStruct((B_pad, out_pad), jnp.float32),
        in_specs=[_VMEM_SPEC() for _ in operands],
        out_specs=_VMEM_SPEC(),
    )(*operands)


# ---------------------------------------------------------------------------
# Model wrapper (glue: batch/output padding, embedding lookup, transposes)
# ---------------------------------------------------------------------------
def multitask_acoustic_shared_forward(p, acoustic_input, text_input,
                                      length_input, task_num=0):
    B, _, A = acoustic_input.shape
    out_dim = p["fc2_w"].shape[0]

    # Pad batch to the native 8-sublane tile; padded rows get length 0 and token 0
    # (padding_idx) so they stay masked inside the LSTM, and are sliced off below.
    B_pad = max(_SUBLANE, ((B + _SUBLANE - 1) // _SUBLANE) * _SUBLANE)
    pad = B_pad - B
    ac_p = jnp.pad(acoustic_input.astype(jnp.float32), ((0, pad), (0, 0), (0, 0)))
    txt_p = jnp.pad(text_input.astype(jnp.int32), ((0, pad), (0, 0)))
    len_p = jnp.pad(length_input.astype(jnp.int32), (0, pad))

    # Pad the final projection to a lane-dense 128-wide slab (zero cols) so the kernel's
    # only HBM store is a full-vreg unmasked store; slice back to out_dim afterwards.
    out_pad = max(_LANE, ((out_dim + _LANE - 1) // _LANE) * _LANE)
    fc2_t = jnp.pad(p["fc2_w"].T, ((0, 0), (0, out_pad - out_dim)))
    fc2_b = jnp.pad(p["fc2_b"], (0, out_pad - out_dim))[None, :]

    # Embedding lookup + time-major transpose (XLA gather; table stays in HBM).
    embs_tbe = jnp.transpose(p["emb_table"][txt_p], (1, 0, 2))   # (T, B_pad, E)

    logits_p = fused_forward(
        ac_p, embs_tbe, len_p[:, None],
        # AcousticOnlyModel fc layers
        p["ac_w1"].T, p["ac_b1"][None, :],
        p["ac_w2"].T, p["ac_b2"][None, :],
        # LSTM (gate order i, f, g, o as in PyTorch)
        p["lstm_w_ih"].T, p["lstm_w_hh"].T,
        (p["lstm_b_ih"] + p["lstm_b_hh"])[None, :],
        # prediction head: split fc1 weight over [acoustic_enc | text_enc]
        p["fc1_w"][:, :A].T, p["fc1_w"][:, A:].T, p["fc1_b"][None, :],
        fc2_t, fc2_b)

    logits = logits_p[:B, :out_dim]

    outs = [None, None, None, None, None]
    outs[task_num] = logits
    return tuple(outs)


# ---------------------------------------------------------------------------
# Pure-JAX reference (for a runtime correctness check of the fused kernel)
# ---------------------------------------------------------------------------
def _ref_forward(p, acoustic_input, text_input, length_input):
    x = jnp.mean(acoustic_input, axis=1)
    h = jnp.tanh(x @ p["ac_w1"].T + p["ac_b1"])
    base = jnp.tanh(h @ p["ac_w2"].T + p["ac_b2"])

    embs = p["emb_table"][text_input]
    B, T, _ = embs.shape
    H = p["lstm_w_hh"].shape[1]

    def step(carry, inp):
        hh, cc = carry
        xt, t = inp
        gates = (xt @ p["lstm_w_ih"].T + hh @ p["lstm_w_hh"].T
                 + p["lstm_b_ih"] + p["lstm_b_hh"])
        i = jax.nn.sigmoid(gates[:, :H])
        f = jax.nn.sigmoid(gates[:, H:2 * H])
        g = jnp.tanh(gates[:, 2 * H:3 * H])
        o = jax.nn.sigmoid(gates[:, 3 * H:])
        c_new = f * cc + i * g
        h_new = o * jnp.tanh(c_new)
        mask = (length_input > t)[:, None]
        return (jnp.where(mask, h_new, hh), jnp.where(mask, c_new, cc)), None

    (txt_enc, _), _ = jax.lax.scan(
        step,
        (jnp.zeros((B, H), jnp.float32), jnp.zeros((B, H), jnp.float32)),
        (jnp.transpose(embs, (1, 0, 2)), jnp.arange(T)))

    inputs = jnp.concatenate([base, txt_enc], axis=1)
    pen = jnp.tanh(inputs @ p["fc1_w"].T + p["fc1_b"])
    return pen @ p["fc2_w"].T + p["fc2_b"]


# ---------------------------------------------------------------------------
# Deterministic parameter construction (shapes implied by the module __init__)
# ---------------------------------------------------------------------------
def make_params(key, *, audio_dim, ac_fc_hidden, vocab, text_dim,
                text_hidden, fc_hidden, out_dim):
    ks = jax.random.split(key, 12)

    def unif(k, shape, fan_in):
        b = 1.0 / jnp.sqrt(jnp.float32(fan_in))
        return jax.random.uniform(k, shape, jnp.float32, -b, b)

    emb = jax.random.normal(ks[0], (vocab, text_dim), jnp.float32)
    norms = jnp.linalg.norm(emb, axis=1, keepdims=True)
    emb = emb * jnp.minimum(1.0, 1.0 / jnp.maximum(norms, 1e-12))   # max_norm=1.0
    emb = emb.at[0].set(0.0)                                        # padding_idx=0

    fc_in = audio_dim + text_hidden
    return {
        # AcousticOnlyModel fc layers
        "ac_w1": unif(ks[1], (ac_fc_hidden, audio_dim), audio_dim),
        "ac_b1": unif(ks[2], (ac_fc_hidden,), audio_dim),
        "ac_w2": unif(ks[3], (audio_dim, ac_fc_hidden), ac_fc_hidden),
        "ac_b2": unif(ks[4], (audio_dim,), ac_fc_hidden),
        # TextPlusPredictionLayer (task 0)
        "emb_table": emb,
        "lstm_w_ih": unif(ks[5], (4 * text_hidden, text_dim), text_hidden),
        "lstm_w_hh": unif(ks[6], (4 * text_hidden, text_hidden), text_hidden),
        "lstm_b_ih": unif(ks[7], (4 * text_hidden,), text_hidden),
        "lstm_b_hh": unif(ks[8], (4 * text_hidden,), text_hidden),
        "fc1_w": unif(ks[9], (fc_hidden, fc_in), fc_in),
        "fc1_b": unif(ks[10], (fc_hidden,), fc_in),
        "fc2_w": unif(ks[11], (out_dim, fc_hidden), fc_hidden),
        "fc2_b": jnp.zeros((out_dim,), jnp.float32),
    }


# ---------------------------------------------------------------------------
if __name__ == "__main__":
    B, T_A, AUDIO_DIM = 2, 12, 16
    AC_FC_HIDDEN = 32
    VOCAB, TEXT_DIM, T_TXT, TEXT_HIDDEN = 50, 16, 8, 32
    FC_HIDDEN, OUT0_DIM = 32, 3

    key = jax.random.PRNGKey(0)
    k_params, k_ac, k_txt = jax.random.split(key, 3)

    params = make_params(k_params,
                         audio_dim=AUDIO_DIM, ac_fc_hidden=AC_FC_HIDDEN,
                         vocab=VOCAB, text_dim=TEXT_DIM, text_hidden=TEXT_HIDDEN,
                         fc_hidden=FC_HIDDEN, out_dim=OUT0_DIM)

    acoustic_input = jax.random.normal(k_ac, (B, T_A, AUDIO_DIM), jnp.float32)
    text_input = jax.random.randint(k_txt, (B, T_TXT), 1, VOCAB, jnp.int32)
    length_input = jnp.array([T_TXT, 5], dtype=jnp.int32)

    # TODO(synk): the acoustic_len_input!=None packed-LSTM branch of AcousticOnlyModel
    # is not exercised (we pass acoustic_len_input=None, matching the default path).
    outs = multitask_acoustic_shared_forward(
        params, acoustic_input, text_input, length_input, task_num=0)

    task0 = jax.block_until_ready(outs[0])
    assert task0.shape == (B, OUT0_DIM)
    assert all(o is None for o in outs[1:])

    ref = _ref_forward(params, acoustic_input, text_input, length_input)
    assert jnp.allclose(task0, ref, atol=1e-3, rtol=1e-3), (task0, ref)

    print("KERNEL_OK")
</pallas_src>

<mosaic_0001>
module attributes {stable_mosaic.version = 11 : i64} {
  func.func @_fused_forward_kernel(%arg0: memref<8x12x16xf32, #tpu.memory_space<vmem>>, %arg1: memref<8x8x16xf32, #tpu.memory_space<vmem>>, %arg2: memref<8x1xi32, #tpu.memory_space<vmem>>, %arg3: memref<16x32xf32, #tpu.memory_space<vmem>>, %arg4: memref<1x32xf32, #tpu.memory_space<vmem>>, %arg5: memref<32x16xf32, #tpu.memory_space<vmem>>, %arg6: memref<1x16xf32, #tpu.memory_space<vmem>>, %arg7: memref<16x128xf32, #tpu.memory_space<vmem>>, %arg8: memref<32x128xf32, #tpu.memory_space<vmem>>, %arg9: memref<1x128xf32, #tpu.memory_space<vmem>>, %arg10: memref<16x32xf32, #tpu.memory_space<vmem>>, %arg11: memref<32x32xf32, #tpu.memory_space<vmem>>, %arg12: memref<1x32xf32, #tpu.memory_space<vmem>>, %arg13: memref<32x128xf32, #tpu.memory_space<vmem>>, %arg14: memref<1x128xf32, #tpu.memory_space<vmem>>, %arg15: memref<8x128xf32, #tpu.memory_space<vmem>>) attributes {dimension_semantics = [], scalar_prefetch = 0 : i64, scratch_operands = 0 : i64, tpu.core_type = #tpu.core_type<tc>} {
    %c0 = arith.constant 0 : index
    %c0_0 = arith.constant 0 : index
    %c0_1 = arith.constant 0 : index
    %0 = vector.load %arg0[%c0, %c0_0, %c0_1] : memref<8x12x16xf32, #tpu.memory_space<vmem>>, vector<8x12x16xf32>
    %cst = arith.constant dense<0.000000e+00> : vector<8x16xf32>
    %1 = vector.multi_reduction <add>, %0, %cst [1] : vector<8x12x16xf32> to vector<8x16xf32>
    %cst_2 = arith.constant 1.200000e+01 : f32
    %2 = vector.broadcast %cst_2 : f32 to vector<8x16xf32>
    %3 = arith.divf %1, %2 : vector<8x16xf32>
    %c0_3 = arith.constant 0 : index
    %c0_4 = arith.constant 0 : index
    %4 = vector.load %arg3[%c0_3, %c0_4] : memref<16x32xf32, #tpu.memory_space<vmem>>, vector<16x32xf32>
    %cst_5 = arith.constant dense<0.000000e+00> : vector<8x32xf32>
    %5 = tpu.matmul %3, %4, %cst_5 {dimension_numbers = #tpu.dot_dimension_numbers<[1], [0], [0], [1], [0, 0, 1, 1], [], []>} : vector<8x16xf32>, vector<16x32xf32>, vector<8x32xf32> -> vector<8x32xf32>
    %c0_6 = arith.constant 0 : index
    %c0_7 = arith.constant 0 : index
    %6 = vector.load %arg4[%c0_6, %c0_7] : memref<1x32xf32, #tpu.memory_space<vmem>>, vector<1x32xf32>
    %7 = vector.broadcast %6 : vector<1x32xf32> to vector<8x32xf32>
    %8 = arith.addf %5, %7 : vector<8x32xf32>
    %9 = math.tanh %8 : vector<8x32xf32>
    %c0_8 = arith.constant 0 : index
    %c0_9 = arith.constant 0 : index
    %10 = vector.load %arg5[%c0_8, %c0_9] : memref<32x16xf32, #tpu.memory_space<vmem>>, vector<32x16xf32>
    %cst_10 = arith.constant dense<0.000000e+00> : vector<8x16xf32>
    %11 = tpu.matmul %9, %10, %cst_10 {dimension_numbers = #tpu.dot_dimension_numbers<[1], [0], [0], [1], [0, 0, 1, 1], [], []>} : vector<8x32xf32>, vector<32x16xf32>, vector<8x16xf32> -> vector<8x16xf32>
    %c0_11 = arith.constant 0 : index
    %c0_12 = arith.constant 0 : index
    %12 = vector.load %arg6[%c0_11, %c0_12] : memref<1x16xf32, #tpu.memory_space<vmem>>, vector<1x16xf32>
    %13 = vector.broadcast %12 : vector<1x16xf32> to vector<8x16xf32>
    %14 = arith.addf %11, %13 : vector<8x16xf32>
    %15 = math.tanh %14 : vector<8x16xf32>
    %c0_13 = arith.constant 0 : index
    %c0_14 = arith.constant 0 : index
    %c0_15 = arith.constant 0 : index
    %16 = vector.load %arg1[%c0_13, %c0_14, %c0_15] : memref<8x8x16xf32, #tpu.memory_space<vmem>>, vector<8x8x16xf32>
    %17 = vector.shape_cast %16 : vector<8x8x16xf32> to vector<64x16xf32>
    %c0_16 = arith.constant 0 : index
    %c0_17 = arith.constant 0 : index
    %18 = vector.load %arg7[%c0_16, %c0_17] : memref<16x128xf32, #tpu.memory_space<vmem>>, vector<16x128xf32>
    %cst_18 = arith.constant dense<0.000000e+00> : vector<64x128xf32>
    %19 = tpu.matmul %17, %18, %cst_18 {dimension_numbers = #tpu.dot_dimension_numbers<[1], [0], [0], [1], [0, 0, 1, 1], [], []>} : vector<64x16xf32>, vector<16x128xf32>, vector<64x128xf32> -> vector<64x128xf32>
    %c0_19 = arith.constant 0 : index
    %c0_20 = arith.constant 0 : index
    %20 = vector.load %arg9[%c0_19, %c0_20] : memref<1x128xf32, #tpu.memory_space<vmem>>, vector<1x128xf32>
    %21 = vector.broadcast %20 : vector<1x128xf32> to vector<64x128xf32>
    %22 = arith.addf %19, %21 : vector<64x128xf32>
    %23 = vector.shape_cast %22 : vector<64x128xf32> to vector<8x8x128xf32>
    %c0_21 = arith.constant 0 : index
    %c0_22 = arith.constant 0 : index
    %24 = vector.load %arg2[%c0_21, %c0_22] : memref<8x1xi32, #tpu.memory_space<vmem>>, vector<8x1xi32>
    %c0_23 = arith.constant 0 : index
    %c0_24 = arith.constant 0 : index
    %25 = vector.load %arg8[%c0_23, %c0_24] : memref<32x128xf32, #tpu.memory_space<vmem>>, vector<32x128xf32>
    %cst_25 = arith.constant 0.000000e+00 : f32
    %26 = vector.broadcast %cst_25 : f32 to vector<8x32xf32>
    %cst_26 = arith.constant 0.000000e+00 : f32
    %27 = vector.broadcast %cst_26 : f32 to vector<8x32xf32>
    %28 = vector.extract_strided_slice %23 {offsets = [0, 0, 0], sizes = [1, 8, 128], strides = [1, 1, 1]} : vector<8x8x128xf32> to vector<1x8x128xf32>
    %29 = vector.shape_cast %28 : vector<1x8x128xf32> to vector<8x128xf32>
    %cst_27 = arith.constant dense<0.000000e+00> : vector<8x128xf32>
    %30 = tpu.matmul %26, %25, %cst_27 {dimension_numbers = #tpu.dot_dimension_numbers<[1], [0], [0], [1], [0, 0, 1, 1], [], []>} : vector<8x32xf32>, vector<32x128xf32>, vector<8x128xf32> -> vector<8x128xf32>
    %31 = arith.addf %29, %30 : vector<8x128xf32>
    %32 = vector.extract_strided_slice %31 {offsets = [0, 0], sizes = [8, 32], strides = [1, 1]} : vector<8x128xf32> to vector<8x32xf32>
    %33 = arith.negf %32 : vector<8x32xf32>
    %34 = math.exp %33 : vector<8x32xf32>
    %cst_28 = arith.constant 1.000000e+00 : f32
    %35 = vector.broadcast %cst_28 : f32 to vector<8x32xf32>
    %36 = arith.addf %35, %34 : vector<8x32xf32>
    %37 = arith.divf %35, %36 : vector<8x32xf32>
    %38 = vector.extract_strided_slice %31 {offsets = [0, 32], sizes = [8, 32], strides = [1, 1]} : vector<8x128xf32> to vector<8x32xf32>
    %39 = arith.negf %38 : vector<8x32xf32>
    %40 = math.exp %39 : vector<8x32xf32>
    %cst_29 = arith.constant 1.000000e+00 : f32
    %41 = vector.broadcast %cst_29 : f32 to vector<8x32xf32>
    %42 = arith.addf %41, %40 : vector<8x32xf32>
    %43 = arith.divf %41, %42 : vector<8x32xf32>
    %44 = vector.extract_strided_slice %31 {offsets = [0, 64], sizes = [8, 32], strides = [1, 1]} : vector<8x128xf32> to vector<8x32xf32>
    %45 = math.tanh %44 : vector<8x32xf32>
    %46 = vector.extract_strided_slice %31 {offsets = [0, 96], sizes = [8, 32], strides = [1, 1]} : vector<8x128xf32> to vector<8x32xf32>
    %47 = arith.negf %46 : vector<8x32xf32>
    %48 = math.exp %47 : vector<8x32xf32>
    %cst_30 = arith.constant 1.000000e+00 : f32
    %49 = vector.broadcast %cst_30 : f32 to vector<8x32xf32>
    %50 = arith.addf %49, %48 : vector<8x32xf32>
    %51 = arith.divf %49, %50 : vector<8x32xf32>
    %52 = arith.mulf %43, %27 : vector<8x32xf32>
    %53 = arith.mulf %37, %45 : vector<8x32xf32>
    %54 = arith.addf %52, %53 : vector<8x32xf32>
    %55 = math.tanh %54 : vector<8x32xf32>
    %56 = arith.mulf %51, %55 : vector<8x32xf32>
    %c0_i32 = arith.constant 0 : i32
    %57 = vector.broadcast %c0_i32 : i32 to vector<8x1xi32>
    %58 = arith.cmpi sgt, %24, %57 : vector<8x1xi32>
    %59 = vector.shape_cast %58 : vector<8x1xi1> to vector<8x1xi1>
    %60 = vector.broadcast %59 : vector<8x1xi1> to vector<8x32xi1>
    %61 = arith.select %60, %56, %26 : vector<8x32xi1>, vector<8x32xf32>
    %62 = vector.shape_cast %58 : vector<8x1xi1> to vector<8x1xi1>
    %63 = vector.broadcast %62 : vector<8x1xi1> to vector<8x32xi1>
    %64 = arith.select %63, %54, %27 : vector<8x32xi1>, vector<8x32xf32>
    %65 = vector.extract_strided_slice %23 {offsets = [1, 0, 0], sizes = [1, 8, 128], strides = [1, 1, 1]} : vector<8x8x128xf32> to vector<1x8x128xf32>
    %66 = vector.shape_cast %65 : vector<1x8x128xf32> to vector<8x128xf32>
    %cst_31 = arith.constant dense<0.000000e+00> : vector<8x128xf32>
    %67 = tpu.matmul %61, %25, %cst_31 {dimension_numbers = #tpu.dot_dimension_numbers<[1], [0], [0], [1], [0, 0, 1, 1], [], []>} : vector<8x32xf32>, vector<32x128xf32>, vector<8x128xf32> -> vector<8x128xf32>
    %68 = arith.addf %66, %67 : vector<8x128xf32>
    %69 = vector.extract_strided_slice %68 {offsets = [0, 0], sizes = [8, 32], strides = [1, 1]} : vector<8x128xf32> to vector<8x32xf32>
    %70 = arith.negf %69 : vector<8x32xf32>
    %71 = math.exp %70 : vector<8x32xf32>
    %cst_32 = arith.constant 1.000000e+00 : f32
    %72 = vector.broadcast %cst_32 : f32 to vector<8x32xf32>
    %73 = arith.addf %72, %71 : vector<8x32xf32>
    %74 = arith.divf %72, %73 : vector<8x32xf32>
    %75 = vector.extract_strided_slice %68 {offsets = [0, 32], sizes = [8, 32], strides = [1, 1]} : vector<8x128xf32> to vector<8x32xf32>
    %76 = arith.negf %75 : vector<8x32xf32>
    %77 = math.exp %76 : vector<8x32xf32>
    %cst_33 = arith.constant 1.000000e+00 : f32
    %78 = vector.broadcast %cst_33 : f32 to vector<8x32xf32>
    %79 = arith.addf %78, %77 : vector<8x32xf32>
    %80 = arith.divf %78, %79 : vector<8x32xf32>
    %81 = vector.extract_strided_slice %68 {offsets = [0, 64], sizes = [8, 32], strides = [1, 1]} : vector<8x128xf32> to vector<8x32xf32>
    %82 = math.tanh %81 : vector<8x32xf32>
    %83 = vector.extract_strided_slice %68 {offsets = [0, 96], sizes = [8, 32], strides = [1, 1]} : vector<8x128xf32> to vector<8x32xf32>
    %84 = arith.negf %83 : vector<8x32xf32>
    %85 = math.exp %84 : vector<8x32xf32>
    %cst_34 = arith.constant 1.000000e+00 : f32
    %86 = vector.broadcast %cst_34 : f32 to vector<8x32xf32>
    %87 = arith.addf %86, %85 : vector<8x32xf32>
    %88 = arith.divf %86, %87 : vector<8x32xf32>
    %89 = arith.mulf %80, %64 : vector<8x32xf32>
    %90 = arith.mulf %74, %82 : vector<8x32xf32>
    %91 = arith.addf %89, %90 : vector<8x32xf32>
    %92 = math.tanh %91 : vector<8x32xf32>
    %93 = arith.mulf %88, %92 : vector<8x32xf32>
    %c1_i32 = arith.constant 1 : i32
    %94 = vector.broadcast %c1_i32 : i32 to vector<8x1xi32>
    %95 = arith.cmpi sgt, %24, %94 : vector<8x1xi32>
    %96 = vector.shape_cast %95 : vector<8x1xi1> to vector<8x1xi1>
    %97 = vector.broadcast %96 : vector<8x1xi1> to vector<8x32xi1>
    %98 = arith.select %97, %93, %61 : vector<8x32xi1>, vector<8x32xf32>
    %99 = vector.shape_cast %95 : vector<8x1xi1> to vector<8x1xi1>
    %100 = vector.broadcast %99 : vector<8x1xi1> to vector<8x32xi1>
    %101 = arith.select %100, %91, %64 : vector<8x32xi1>, vector<8x32xf32>
    %102 = vector.extract_strided_slice %23 {offsets = [2, 0, 0], sizes = [1, 8, 128], strides = [1, 1, 1]} : vector<8x8x128xf32> to vector<1x8x128xf32>
    %103 = vector.shape_cast %102 : vector<1x8x128xf32> to vector<8x128xf32>
    %cst_35 = arith.constant dense<0.000000e+00> : vector<8x128xf32>
    %104 = tpu.matmul %98, %25, %cst_35 {dimension_numbers = #tpu.dot_dimension_numbers<[1], [0], [0], [1], [0, 0, 1, 1], [], []>} : vector<8x32xf32>, vector<32x128xf32>, vector<8x128xf32> -> vector<8x128xf32>
    %105 = arith.addf %103, %104 : vector<8x128xf32>
    %106 = vector.extract_strided_slice %105 {offsets = [0, 0], sizes = [8, 32], strides = [1, 1]} : vector<8x128xf32> to vector<8x32xf32>
    %107 = arith.negf %106 : vector<8x32xf32>
    %108 = math.exp %107 : vector<8x32xf32>
    %cst_36 = arith.constant 1.000000e+00 : f32
    %109 = vector.broadcast %cst_36 : f32 to vector<8x32xf32>
    %110 = arith.addf %109, %108 : vector<8x32xf32>
    %111 = arith.divf %109, %110 : vector<8x32xf32>
    %112 = vector.extract_strided_slice %105 {offsets = [0, 32], sizes = [8, 32], strides = [1, 1]} : vector<8x128xf32> to vector<8x32xf32>
    %113 = arith.negf %112 : vector<8x32xf32>
    %114 = math.exp %113 : vector<8x32xf32>
    %cst_37 = arith.constant 1.000000e+00 : f32
    %115 = vector.broadcast %cst_37 : f32 to vector<8x32xf32>
    %116 = arith.addf %115, %114 : vector<8x32xf32>
    %117 = arith.divf %115, %116 : vector<8x32xf32>
    %118 = vector.extract_strided_slice %105 {offsets = [0, 64], sizes = [8, 32], strides = [1, 1]} : vector<8x128xf32> to vector<8x32xf32>
    %119 = math.tanh %118 : vector<8x32xf32>
    %120 = vector.extract_strided_slice %105 {offsets = [0, 96], sizes = [8, 32], strides = [1, 1]} : vector<8x128xf32> to vector<8x32xf32>
    %121 = arith.negf %120 : vector<8x32xf32>
    %122 = math.exp %121 : vector<8x32xf32>
    %cst_38 = arith.constant 1.000000e+00 : f32
    %123 = vector.broadcast %cst_38 : f32 to vector<8x32xf32>
    %124 = arith.addf %123, %122 : vector<8x32xf32>
    %125 = arith.divf %123, %124 : vector<8x32xf32>
    %126 = arith.mulf %117, %101 : vector<8x32xf32>
    %127 = arith.mulf %111, %119 : vector<8x32xf32>
    %128 = arith.addf %126, %127 : vector<8x32xf32>
    %129 = math.tanh %128 : vector<8x32xf32>
    %130 = arith.mulf %125, %129 : vector<8x32xf32>
    %c2_i32 = arith.constant 2 : i32
    %131 = vector.broadcast %c2_i32 : i32 to vector<8x1xi32>
    %132 = arith.cmpi sgt, %24, %131 : vector<8x1xi32>
    %133 = vector.shape_cast %132 : vector<8x1xi1> to vector<8x1xi1>
    %134 = vector.broadcast %133 : vector<8x1xi1> to vector<8x32xi1>
    %135 = arith.select %134, %130, %98 : vector<8x32xi1>, vector<8x32xf32>
    %136 = vector.shape_cast %132 : vector<8x1xi1> to vector<8x1xi1>
    %137 = vector.broadcast %136 : vector<8x1xi1> to vector<8x32xi1>
    %138 = arith.select %137, %128, %101 : vector<8x32xi1>, vector<8x32xf32>
    %139 = vector.extract_strided_slice %23 {offsets = [3, 0, 0], sizes = [1, 8, 128], strides = [1, 1, 1]} : vector<8x8x128xf32> to vector<1x8x128xf32>
    %140 = vector.shape_cast %139 : vector<1x8x128xf32> to vector<8x128xf32>
    %cst_39 = arith.constant dense<0.000000e+00> : vector<8x128xf32>
    %141 = tpu.matmul %135, %25, %cst_39 {dimension_numbers = #tpu.dot_dimension_numbers<[1], [0], [0], [1], [0, 0, 1, 1], [], []>} : vector<8x32xf32>, vector<32x128xf32>, vector<8x128xf32> -> vector<8x128xf32>
    %142 = arith.addf %140, %141 : vector<8x128xf32>
    %143 = vector.extract_strided_slice %142 {offsets = [0, 0], sizes = [8, 32], strides = [1, 1]} : vector<8x128xf32> to vector<8x32xf32>
    %144 = arith.negf %143 : vector<8x32xf32>
    %145 = math.exp %144 : vector<8x32xf32>
    %cst_40 = arith.constant 1.000000e+00 : f32
    %146 = vector.broadcast %cst_40 : f32 to vector<8x32xf32>
    %147 = arith.addf %146, %145 : vector<8x32xf32>
    %148 = arith.divf %146, %147 : vector<8x32xf32>
    %149 = vector.extract_strided_slice %142 {offsets = [0, 32], sizes = [8, 32], strides = [1, 1]} : vector<8x128xf32> to vector<8x32xf32>
    %150 = arith.negf %149 : vector<8x32xf32>
    %151 = math.exp %150 : vector<8x32xf32>
    %cst_41 = arith.constant 1.000000e+00 : f32
    %152 = vector.broadcast %cst_41 : f32 to vector<8x32xf32>
    %153 = arith.addf %152, %151 : vector<8x32xf32>
    %154 = arith.divf %152, %153 : vector<8x32xf32>
    %155 = vector.extract_strided_slice %142 {offsets = [0, 64], sizes = [8, 32], strides = [1, 1]} : vector<8x128xf32> to vector<8x32xf32>
    %156 = math.tanh %155 : vector<8x32xf32>
    %157 = vector.extract_strided_slice %142 {offsets = [0, 96], sizes = [8, 32], strides = [1, 1]} : vector<8x128xf32> to vector<8x32xf32>
    %158 = arith.negf %157 : vector<8x32xf32>
    %159 = math.exp %158 : vector<8x32xf32>
    %cst_42 = arith.constant 1.000000e+00 : f32
    %160 = vector.broadcast %cst_42 : f32 to vector<8x32xf32>
    %161 = arith.addf %160, %159 : vector<8x32xf32>
    %162 = arith.divf %160, %161 : vector<8x32xf32>
    %163 = arith.mulf %154, %138 : vector<8x32xf32>
    %164 = arith.mulf %148, %156 : vector<8x32xf32>
    %165 = arith.addf %163, %164 : vector<8x32xf32>
    %166 = math.tanh %165 : vector<8x32xf32>
    %167 = arith.mulf %162, %166 : vector<8x32xf32>
    %c3_i32 = arith.constant 3 : i32
    %168 = vector.broadcast %c3_i32 : i32 to vector<8x1xi32>
    %169 = arith.cmpi sgt, %24, %168 : vector<8x1xi32>
    %170 = vector.shape_cast %169 : vector<8x1xi1> to vector<8x1xi1>
    %171 = vector.broadcast %170 : vector<8x1xi1> to vector<8x32xi1>
    %172 = arith.select %171, %167, %135 : vector<8x32xi1>, vector<8x32xf32>
    %173 = vector.shape_cast %169 : vector<8x1xi1> to vector<8x1xi1>
    %174 = vector.broadcast %173 : vector<8x1xi1> to vector<8x32xi1>
    %175 = arith.select %174, %165, %138 : vector<8x32xi1>, vector<8x32xf32>
    %176 = vector.extract_strided_slice %23 {offsets = [4, 0, 0], sizes = [1, 8, 128], strides = [1, 1, 1]} : vector<8x8x128xf32> to vector<1x8x128xf32>
    %177 = vector.shape_cast %176 : vector<1x8x128xf32> to vector<8x128xf32>
    %cst_43 = arith.constant dense<0.000000e+00> : vector<8x128xf32>
    %178 = tpu.matmul %172, %25, %cst_43 {dimension_numbers = #tpu.dot_dimension_numbers<[1], [0], [0], [1], [0, 0, 1, 1], [], []>} : vector<8x32xf32>, vector<32x128xf32>, vector<8x128xf32> -> vector<8x128xf32>
    %179 = arith.addf %177, %178 : vector<8x128xf32>
    %180 = vector.extract_strided_slice %179 {offsets = [0, 0], sizes = [8, 32], strides = [1, 1]} : vector<8x128xf32> to vector<8x32xf32>
    %181 = arith.negf %180 : vector<8x32xf32>
    %182 = math.exp %181 : vector<8x32xf32>
    %cst_44 = arith.constant 1.000000e+00 : f32
    %183 = vector.broadcast %cst_44 : f32 to vector<8x32xf32>
    %184 = arith.addf %183, %182 : vector<8x32xf32>
    %185 = arith.divf %183, %184 : vector<8x32xf32>
    %186 = vector.extract_strided_slice %179 {offsets = [0, 32], sizes = [8, 32], strides = [1, 1]} : vector<8x128xf32> to vector<8x32xf32>
    %187 = arith.negf %186 : vector<8x32xf32>
    %188 = math.exp %187 : vector<8x32xf32>
    %cst_45 = arith.constant 1.000000e+00 : f32
    %189 = vector.broadcast %cst_45 : f32 to vector<8x32xf32>
    %190 = arith.addf %189, %188 : vector<8x32xf32>
    %191 = arith.divf %189, %190 : vector<8x32xf32>
    %192 = vector.extract_strided_slice %179 {offsets = [0, 64], sizes = [8, 32], strides = [1, 1]} : vector<8x128xf32> to vector<8x32xf32>
    %193 = math.tanh %192 : vector<8x32xf32>
    %194 = vector.extract_strided_slice %179 {offsets = [0, 96], sizes = [8, 32], strides = [1, 1]} : vector<8x128xf32> to vector<8x32xf32>
    %195 = arith.negf %194 : vector<8x32xf32>
    %196 = math.exp %195 : vector<8x32xf32>
    %cst_46 = arith.constant 1.000000e+00 : f32
    %197 = vector.broadcast %cst_46 : f32 to vector<8x32xf32>
    %198 = arith.addf %197, %196 : vector<8x32xf32>
    %199 = arith.divf %197, %198 : vector<8x32xf32>
    %200 = arith.mulf %191, %175 : vector<8x32xf32>
    %201 = arith.mulf %185, %193 : vector<8x32xf32>
    %202 = arith.addf %200, %201 : vector<8x32xf32>
    %203 = math.tanh %202 : vector<8x32xf32>
    %204 = arith.mulf %199, %203 : vector<8x32xf32>
    %c4_i32 = arith.constant 4 : i32
    %205 = vector.broadcast %c4_i32 : i32 to vector<8x1xi32>
    %206 = arith.cmpi sgt, %24, %205 : vector<8x1xi32>
    %207 = vector.shape_cast %206 : vector<8x1xi1> to vector<8x1xi1>
    %208 = vector.broadcast %207 : vector<8x1xi1> to vector<8x32xi1>
    %209 = arith.select %208, %204, %172 : vector<8x32xi1>, vector<8x32xf32>
    %210 = vector.shape_cast %206 : vector<8x1xi1> to vector<8x1xi1>
    %211 = vector.broadcast %210 : vector<8x1xi1> to vector<8x32xi1>
    %212 = arith.select %211, %202, %175 : vector<8x32xi1>, vector<8x32xf32>
    %213 = vector.extract_strided_slice %23 {offsets = [5, 0, 0], sizes = [1, 8, 128], strides = [1, 1, 1]} : vector<8x8x128xf32> to vector<1x8x128xf32>
    %214 = vector.shape_cast %213 : vector<1x8x128xf32> to vector<8x128xf32>
    %cst_47 = arith.constant dense<0.000000e+00> : vector<8x128xf32>
    %215 = tpu.matmul %209, %25, %cst_47 {dimension_numbers = #tpu.dot_dimension_numbers<[1], [0], [0], [1], [0, 0, 1, 1], [], []>} : vector<8x32xf32>, vector<32x128xf32>, vector<8x128xf32> -> vector<8x128xf32>
    %216 = arith.addf %214, %215 : vector<8x128xf32>
    %217 = vector.extract_strided_slice %216 {offsets = [0, 0], sizes = [8, 32], strides = [1, 1]} : vector<8x128xf32> to vector<8x32xf32>
    %218 = arith.negf %217 : vector<8x32xf32>
    %219 = math.exp %218 : vector<8x32xf32>
    %cst_48 = arith.constant 1.000000e+00 : f32
    %220 = vector.broadcast %cst_48 : f32 to vector<8x32xf32>
    %221 = arith.addf %220, %219 : vector<8x32xf32>
    %222 = arith.divf %220, %221 : vector<8x32xf32>
    %223 = vector.extract_strided_slice %216 {offsets = [0, 32], sizes = [8, 32], strides = [1, 1]} : vector<8x128xf32> to vector<8x32xf32>
    %224 = arith.negf %223 : vector<8x32xf32>
    %225 = math.exp %224 : vector<8x32xf32>
    %cst_49 = arith.constant 1.000000e+00 : f32
    %226 = vector.broadcast %cst_49 : f32 to vector<8x32xf32>
    %227 = arith.addf %226, %225 : vector<8x32xf32>
    %228 = arith.divf %226, %227 : vector<8x32xf32>
    %229 = vector.extract_strided_slice %216 {offsets = [0, 64], sizes = [8, 32], strides = [1, 1]} : vector<8x128xf32> to vector<8x32xf32>
    %230 = math.tanh %229 : vector<8x32xf32>
    %231 = vector.extract_strided_slice %216 {offsets = [0, 96], sizes = [8, 32], strides = [1, 1]} : vector<8x128xf32> to vector<8x32xf32>
    %232 = arith.negf %231 : vector<8x32xf32>
    %233 = math.exp %232 : vector<8x32xf32>
    %cst_50 = arith.constant 1.000000e+00 : f32
    %234 = vector.broadcast %cst_50 : f32 to vector<8x32xf32>
    %235 = arith.addf %234, %233 : vector<8x32xf32>
    %236 = arith.divf %234, %235 : vector<8x32xf32>
    %237 = arith.mulf %228, %212 : vector<8x32xf32>
    %238 = arith.mulf %222, %230 : vector<8x32xf32>
    %239 = arith.addf %237, %238 : vector<8x32xf32>
    %240 = math.tanh %239 : vector<8x32xf32>
    %241 = arith.mulf %236, %240 : vector<8x32xf32>
    %c5_i32 = arith.constant 5 : i32
    %242 = vector.broadcast %c5_i32 : i32 to vector<8x1xi32>
    %243 = arith.cmpi sgt, %24, %242 : vector<8x1xi32>
    %244 = vector.shape_cast %243 : vector<8x1xi1> to vector<8x1xi1>
    %245 = vector.broadcast %244 : vector<8x1xi1> to vector<8x32xi1>
    %246 = arith.select %245, %241, %209 : vector<8x32xi1>, vector<8x32xf32>
    %247 = vector.shape_cast %243 : vector<8x1xi1> to vector<8x1xi1>
    %248 = vector.broadcast %247 : vector<8x1xi1> to vector<8x32xi1>
    %249 = arith.select %248, %239, %212 : vector<8x32xi1>, vector<8x32xf32>
    %250 = vector.extract_strided_slice %23 {offsets = [6, 0, 0], sizes = [1, 8, 128], strides = [1, 1, 1]} : vector<8x8x128xf32> to vector<1x8x128xf32>
    %251 = vector.shape_cast %250 : vector<1x8x128xf32> to vector<8x128xf32>
    %cst_51 = arith.constant dense<0.000000e+00> : vector<8x128xf32>
    %252 = tpu.matmul %246, %25, %cst_51 {dimension_numbers = #tpu.dot_dimension_numbers<[1], [0], [0], [1], [0, 0, 1, 1], [], []>} : vector<8x32xf32>, vector<32x128xf32>, vector<8x128xf32> -> vector<8x128xf32>
    %253 = arith.addf %251, %252 : vector<8x128xf32>
    %254 = vector.extract_strided_slice %253 {offsets = [0, 0], sizes = [8, 32], strides = [1, 1]} : vector<8x128xf32> to vector<8x32xf32>
    %255 = arith.negf %254 : vector<8x32xf32>
    %256 = math.exp %255 : vector<8x32xf32>
    %cst_52 = arith.constant 1.000000e+00 : f32
    %257 = vector.broadcast %cst_52 : f32 to vector<8x32xf32>
    %258 = arith.addf %257, %256 : vector<8x32xf32>
    %259 = arith.divf %257, %258 : vector<8x32xf32>
    %260 = vector.extract_strided_slice %253 {offsets = [0, 32], sizes = [8, 32], strides = [1, 1]} : vector<8x128xf32> to vector<8x32xf32>
    %261 = arith.negf %260 : vector<8x32xf32>
    %262 = math.exp %261 : vector<8x32xf32>
    %cst_53 = arith.constant 1.000000e+00 : f32
    %263 = vector.broadcast %cst_53 : f32 to vector<8x32xf32>
    %264 = arith.addf %263, %262 : vector<8x32xf32>
    %265 = arith.divf %263, %264 : vector<8x32xf32>
    %266 = vector.extract_strided_slice %253 {offsets = [0, 64], sizes = [8, 32], strides = [1, 1]} : vector<8x128xf32> to vector<8x32xf32>
    %267 = math.tanh %266 : vector<8x32xf32>
    %268 = vector.extract_strided_slice %253 {offsets = [0, 96], sizes = [8, 32], strides = [1, 1]} : vector<8x128xf32> to vector<8x32xf32>
    %269 = arith.negf %268 : vector<8x32xf32>
    %270 = math.exp %269 : vector<8x32xf32>
    %cst_54 = arith.constant 1.000000e+00 : f32
    %271 = vector.broadcast %cst_54 : f32 to vector<8x32xf32>
    %272 = arith.addf %271, %270 : vector<8x32xf32>
    %273 = arith.divf %271, %272 : vector<8x32xf32>
    %274 = arith.mulf %265, %249 : vector<8x32xf32>
    %275 = arith.mulf %259, %267 : vector<8x32xf32>
    %276 = arith.addf %274, %275 : vector<8x32xf32>
    %277 = math.tanh %276 : vector<8x32xf32>
    %278 = arith.mulf %273, %277 : vector<8x32xf32>
    %c6_i32 = arith.constant 6 : i32
    %279 = vector.broadcast %c6_i32 : i32 to vector<8x1xi32>
    %280 = arith.cmpi sgt, %24, %279 : vector<8x1xi32>
    %281 = vector.shape_cast %280 : vector<8x1xi1> to vector<8x1xi1>
    %282 = vector.broadcast %281 : vector<8x1xi1> to vector<8x32xi1>
    %283 = arith.select %282, %278, %246 : vector<8x32xi1>, vector<8x32xf32>
    %284 = vector.shape_cast %280 : vector<8x1xi1> to vector<8x1xi1>
    %285 = vector.broadcast %284 : vector<8x1xi1> to vector<8x32xi1>
    %286 = arith.select %285, %276, %249 : vector<8x32xi1>, vector<8x32xf32>
    %287 = vector.extract_strided_slice %23 {offsets = [7, 0, 0], sizes = [1, 8, 128], strides = [1, 1, 1]} : vector<8x8x128xf32> to vector<1x8x128xf32>
    %288 = vector.shape_cast %287 : vector<1x8x128xf32> to vector<8x128xf32>
    %cst_55 = arith.constant dense<0.000000e+00> : vector<8x128xf32>
    %289 = tpu.matmul %283, %25, %cst_55 {dimension_numbers = #tpu.dot_dimension_numbers<[1], [0], [0], [1], [0, 0, 1, 1], [], []>} : vector<8x32xf32>, vector<32x128xf32>, vector<8x128xf32> -> vector<8x128xf32>
    %290 = arith.addf %288, %289 : vector<8x128xf32>
    %291 = vector.extract_strided_slice %290 {offsets = [0, 0], sizes = [8, 32], strides = [1, 1]} : vector<8x128xf32> to vector<8x32xf32>
    %292 = arith.negf %291 : vector<8x32xf32>
    %293 = math.exp %292 : vector<8x32xf32>
    %cst_56 = arith.constant 1.000000e+00 : f32
    %294 = vector.broadcast %cst_56 : f32 to vector<8x32xf32>
    %295 = arith.addf %294, %293 : vector<8x32xf32>
    %296 = arith.divf %294, %295 : vector<8x32xf32>
    %297 = vector.extract_strided_slice %290 {offsets = [0, 32], sizes = [8, 32], strides = [1, 1]} : vector<8x128xf32> to vector<8x32xf32>
    %298 = arith.negf %297 : vector<8x32xf32>
    %299 = math.exp %298 : vector<8x32xf32>
    %cst_57 = arith.constant 1.000000e+00 : f32
    %300 = vector.broadcast %cst_57 : f32 to vector<8x32xf32>
    %301 = arith.addf %300, %299 : vector<8x32xf32>
    %302 = arith.divf %300, %301 : vector<8x32xf32>
    %303 = vector.extract_strided_slice %290 {offsets = [0, 64], sizes = [8, 32], strides = [1, 1]} : vector<8x128xf32> to vector<8x32xf32>
    %304 = math.tanh %303 : vector<8x32xf32>
    %305 = vector.extract_strided_slice %290 {offsets = [0, 96], sizes = [8, 32], strides = [1, 1]} : vector<8x128xf32> to vector<8x32xf32>
    %306 = arith.negf %305 : vector<8x32xf32>
    %307 = math.exp %306 : vector<8x32xf32>
    %cst_58 = arith.constant 1.000000e+00 : f32
    %308 = vector.broadcast %cst_58 : f32 to vector<8x32xf32>
    %309 = arith.addf %308, %307 : vector<8x32xf32>
    %310 = arith.divf %308, %309 : vector<8x32xf32>
    %311 = arith.mulf %302, %286 : vector<8x32xf32>
    %312 = arith.mulf %296, %304 : vector<8x32xf32>
    %313 = arith.addf %311, %312 : vector<8x32xf32>
    %314 = math.tanh %313 : vector<8x32xf32>
    %315 = arith.mulf %310, %314 : vector<8x32xf32>
    %c7_i32 = arith.constant 7 : i32
    %316 = vector.broadcast %c7_i32 : i32 to vector<8x1xi32>
    %317 = arith.cmpi sgt, %24, %316 : vector<8x1xi32>
    %318 = vector.shape_cast %317 : vector<8x1xi1> to vector<8x1xi1>
    %319 = vector.broadcast %318 : vector<8x1xi1> to vector<8x32xi1>
    %320 = arith.select %319, %315, %283 : vector<8x32xi1>, vector<8x32xf32>
    %c0_59 = arith.constant 0 : index
    %c0_60 = arith.constant 0 : index
    %321 = vector.load %arg10[%c0_59, %c0_60] : memref<16x32xf32, #tpu.memory_space<vmem>>, vector<16x32xf32>
    %cst_61 = arith.constant dense<0.000000e+00> : vector<8x32xf32>
    %322 = tpu.matmul %15, %321, %cst_61 {dimension_numbers = #tpu.dot_dimension_numbers<[1], [0], [0], [1], [0, 0, 1, 1], [], []>} : vector<8x16xf32>, vector<16x32xf32>, vector<8x32xf32> -> vector<8x32xf32>
    %c0_62 = arith.constant 0 : index
    %c0_63 = arith.constant 0 : index
    %323 = vector.load %arg11[%c0_62, %c0_63] : memref<32x32xf32, #tpu.memory_space<vmem>>, vector<32x32xf32>
    %cst_64 = arith.constant dense<0.000000e+00> : vector<8x32xf32>
    %324 = tpu.matmul %320, %323, %cst_64 {dimension_numbers = #tpu.dot_dimension_numbers<[1], [0], [0], [1], [0, 0, 1, 1], [], []>} : vector<8x32xf32>, vector<32x32xf32>, vector<8x32xf32> -> vector<8x32xf32>
    %325 = arith.addf %322, %324 : vector<8x32xf32>
    %c0_65 = arith.constant 0 : index
    %c0_66 = arith.constant 0 : index
    %326 = vector.load %arg12[%c0_65, %c0_66] : memref<1x32xf32, #tpu.memory_space<vmem>>, vector<1x32xf32>
    %327 = vector.broadcast %326 : vector<1x32xf32> to vector<8x32xf32>
    %328 = arith.addf %325, %327 : vector<8x32xf32>
    %329 = math.tanh %328 : vector<8x32xf32>
    %c0_67 = arith.constant 0 : index
    %c0_68 = arith.constant 0 : index
    %330 = vector.load %arg13[%c0_67, %c0_68] : memref<32x128xf32, #tpu.memory_space<vmem>>, vector<32x128xf32>
    %cst_69 = arith.constant dense<0.000000e+00> : vector<8x128xf32>
    %331 = tpu.matmul %329, %330, %cst_69 {dimension_numbers = #tpu.dot_dimension_numbers<[1], [0], [0], [1], [0, 0, 1, 1], [], []>} : vector<8x32xf32>, vector<32x128xf32>, vector<8x128xf32> -> vector<8x128xf32>
    %c0_70 = arith.constant 0 : index
    %c0_71 = arith.constant 0 : index
    %332 = vector.load %arg14[%c0_70, %c0_71] : memref<1x128xf32, #tpu.memory_space<vmem>>, vector<1x128xf32>
    %333 = vector.broadcast %332 : vector<1x128xf32> to vector<8x128xf32>
    %334 = arith.addf %331, %333 : vector<8x128xf32>
    %c0_72 = arith.constant 0 : index
    %c0_73 = arith.constant 0 : index
    %335 = vector.load %arg15[%c0_72, %c0_73] : memref<8x128xf32, #tpu.memory_space<vmem>>, vector<8x128xf32>
    tpu.vector_store %arg15[%c0_72, %c0_73], %334 {strides = array<i32>} : memref<8x128xf32, #tpu.memory_space<vmem>>, vector<8x128xf32>,
    return
  }
}

</mosaic_0001>

<bundles_post_ra>
// kernel: tpu_custom_call.1
= control target key start
LH: loop header
LB: loop body
LE: loop exit
PB: predicated region body
PF: predicated region fallthrough
CT: control target
= control target key end

     0   :  { %vm67_vm0 = vcmask 130048   ;;  %vm69_vm1 = vcmask 125952   ;;  %v1139_v25 = vmov 12.0   ;;  %s1540_s0 = inlined_call_operand.vmem [shape: f32[8,12,16], index: 0, kind: input, shape index: {}]   ;;  %s1541_s1 = inlined_call_operand.vmem [shape: f32[8,8,16], index: 1, kind: input, shape index: {}]   ;;  %s1542_s2 = inlined_call_operand.vmem [shape: s32[8,1], index: 2, kind: input, shape index: {}]   ;;  %s1543_s3 = inlined_call_operand.vmem [shape: f32[16,32], index: 3, kind: input, shape index: {}]   ;;  %s1544_s4 = inlined_call_operand.vmem [shape: f32[1,32], index: 4, kind: input, shape index: {}]   ;;  %s1545_s5 = inlined_call_operand.vmem [shape: f32[32,16], index: 5, kind: input, shape index: {}]   ;;  %s1546_s6 = inlined_call_operand.vmem [shape: f32[1,16], index: 6, kind: input, shape index: {}]   ;;  %s1547_s7 = inlined_call_operand.vmem [shape: f32[16,128], index: 7, kind: input, shape index: {}]   ;;  %s1548_s8 = inlined_call_operand.vmem [shape: f32[32,128], index: 8, kind: input, shape index: {}]   ;;  %s1549_s9 = inlined_call_operand.vmem [shape: f32[1,128], index: 9, kind: input, shape index: {}]   ;;  %s1550_s10 = inlined_call_operand.vmem [shape: f32[16,32], index: 10, kind: input, shape index: {}]   ;;  %s1551_s11 = inlined_call_operand.vmem [shape: f32[32,32], index: 11, kind: input, shape index: {}]   ;;  %s1552_s12 = inlined_call_operand.vmem [shape: f32[1,32], index: 12, kind: input, shape index: {}]   ;;  %s1553_s13 = inlined_call_operand.vmem [shape: f32[32,128], index: 13, kind: input, shape index: {}]   ;;  %s1554_s14 = inlined_call_operand.vmem [shape: f32[1,128], index: 14, kind: input, shape index: {}]   ;;  %s1555_s15 = inlined_call_operand.hbm [shape: f32[8,128], index: 15, kind: output, shape index: {}]  }
   0x1   :  { %v157_v0 = vld [vmem:[%s1543_s3 + $0x8] sm:$0xff]  ;;  %v156_v1 = vld [vmem:[%s1543_s3] sm:$0xff]  ;;  %v53_v4 = vld [vmem:[%s1540_s0 + $0x10] sm:$0xff]  ;;  %1041 = vrcp.f32 %v1139_v25 }
   0x2   :  { %v51_v2 = vld [vmem:[%s1540_s0] sm:$0xff]  ;;  %200 = vmatpush.msra.mxu0 %v157_v0  ;;  %v52_v3 = vld [vmem:[%s1540_s0 + $0x8] sm:$0xf]  ;;  %v54_v5 = vld [vmem:[%s1540_s0 + $0x18] sm:$0xf]  ;;  %v78_v10 = vsel %vm67_vm0, %v53_v4, 0.0 }
   0x3   :  { %v68_v6 = vsel %vm67_vm0, %v51_v2, 0.0  ;;  %v55_v7 = vld [vmem:[%s1540_s0 + $0x20] sm:$0xff]  ;;  %v56_v8 = vld [vmem:[%s1540_s0 + $0x28] sm:$0xf]  ;;  %v70_v9 = vsel %vm69_vm1, %v52_v3, 0.0  ;;  %v57_v11 = vld [vmem:[%s1540_s0 + $0x30] sm:$0xff] }
   0x4   :  { %201 = vmatpush.msra.mxu0 %v156_v1  ;;  %v58_v12 = vld [vmem:[%s1540_s0 + $0x38] sm:$0xf]  ;;  %v59_v13 = vld [vmem:[%s1540_s0 + $0x40] sm:$0xff]  ;;  %v71_v14 = vadd.f32 %v70_v9, %v68_v6  ;;  %v79_v15 = vsel %vm69_vm1, %v54_v5, 0.0  ;;  %v60_v16 = vld [vmem:[%s1540_s0 + $0x48] sm:$0xf] }
   0x5   :  { %v80_v17 = vadd.f32 %v79_v15, %v78_v10  ;;  %v87_v18 = vsel %vm67_vm0, %v55_v7, 0.0  ;;  %v88_v19 = vsel %vm69_vm1, %v56_v8, 0.0  ;;  %v61_v20 = vld [vmem:[%s1540_s0 + $0x50] sm:$0xff]  ;;  %v62_v21 = vld [vmem:[%s1540_s0 + $0x58] sm:$0xf]  ;;  %v63_v22 = vld [vmem:[%s1540_s0 + $0x60] sm:$0xff] }
   0x6   :  { %v72_v23 = vrot.slane %v71_v14, 4  ;;  %v89_v24 = vadd.f32 %v88_v19, %v87_v18  ;;  %v96_v27 = vsel %vm67_vm0, %v57_v11, 0.0  ;;  %v97_v28 = vsel %vm69_vm1, %v58_v12, 0.0  ;;  %v64_v30 = vld [vmem:[%s1540_s0 + $0x68] sm:$0xf] }
   0x7   :  { %v81_v26 = vrot.slane %v80_v17, 4  ;;  %v105_v29 = vsel %vm67_vm0, %v59_v13, 0.0  ;;  %v98_v33 = vadd.f32 %v97_v28, %v96_v27  ;;  %v106_v34 = vsel %vm69_vm1, %v60_v16, 0.0 }
   0x8   :  { %v73_v31 = vadd.f32 %v72_v23, %v71_v14  ;;  %v90_v32 = vrot.slane %v89_v24, 4  ;;  %v107_v36 = vadd.f32 %v106_v34, %v105_v29  ;;  %v114_v37 = vsel %vm67_vm0, %v61_v20, 0.0 }
   0x9   :  { %v82_v35 = vadd.f32 %v81_v26, %v80_v17  ;;  %v115_v38 = vsel %vm69_vm1, %v62_v21, 0.0  ;;  %v99_v41 = vrot.slane %v98_v33, 4 }
   0xa   :  { %v74_v39 = vrot.slane %v73_v31, 2  ;;  %v91_v40 = vadd.f32 %v90_v32, %v89_v24  ;;  %v116_v42 = vadd.f32 %v115_v38, %v114_v37 }
   0xb   :  { %20 = vsyncpa [#allocation3], 0  ;;  %v65_v43 = vld [vmem:[%s1540_s0 + $0x70] sm:$0xff]  ;;  %v83_v44 = vrot.slane %v82_v35, 2  ;;  %v108_v45 = vrot.slane %v107_v36, 4  ;;  %v123_v46 = vsel %vm67_vm0, %v63_v22, 0.0  ;;  %v1042_v48 = vpop.eup %1041  ;;  %v100_v51 = vadd.f32 %v99_v41, %v98_v33 }
   0xc   :  { %v124_v47 = vsel %vm69_vm1, %v64_v30, 0.0  ;;  %v66_v49 = vld [vmem:[%s1540_s0 + $0x78] sm:$0xf]  ;;  %v92_v50 = vrot.slane %v91_v40, 2  ;;  %v117_v52 = vrot.slane %v116_v42, 4  ;;  %v75_v53 = vadd.f32 %v74_v39, %v73_v31  ;;  %s1141_s26 = smov 64  }
   0xd   :  { %v109_v54 = vadd.f32 %v108_v45, %v107_v36  ;;  %v125_v55 = vadd.f32 %v124_v47, %v123_v46  ;;  %v84_v56 = vadd.f32 %v83_v44, %v82_v35  ;;  %v101_v57 = vrot.slane %v100_v51, 2  ;;  %s988_s24 = sshll.u32 %s1555_s15, 4  ;;  %s989_s24 = int_to_ptr.hbm [resolvable:$true] %s988_s24 }
   0xe   :  { %v118_v58 = vadd.f32 %v117_v52, %v116_v42  ;;  %v132_v59 = vsel %vm67_vm0, %v65_v43, 0.0  ;;  %v93_v60 = vadd.f32 %v92_v50, %v91_v40  ;;  %v133_v63 = vsel %vm69_vm1, %v66_v49, 0.0  ;;  %v209_v49 = vld [vmem:[%s1545_s5 + $0x10] sm:$0xff]  ;;  %v208_v50 = vld [vmem:[%s1545_s5 + $0x8] sm:$0xff]  ;;  %v1311_v52 = vld [vmem:[%s1548_s8 + $0x18] sm:$0xff] }
   0xf   :  { %v110_v61 = vrot.slane %v109_v54, 2  ;;  %v126_v62 = vrot.slane %v125_v55, 4  ;;  %v102_v0 = vadd.f32 %v101_v57, %v100_v51  ;;  %v134_v4 = vadd.f32 %v133_v63, %v132_v59  ;;  %v207_v51 = vld [vmem:[%s1545_s5] sm:$0xff]  ;;  %410 = vmatpush.msrb.mxu0 %v1311_v52 }
  0x10   :  { %v119_v1 = vrot.slane %v118_v58, 2  ;;  %v76_v5 = vrot.slane %v75_v53, 1  ;;  %v85_v6 = vrot.slane %v84_v56, 1  ;;  %v142_v8 = vmul.f32 12.0, %v1042_v48  ;;  %v248_v57 = vld [vmem:[%s1547_s7] sm:$0xff] }
  0x11   :  { %v111_v2 = vadd.f32 %v110_v61, %v109_v54  ;;  %v127_v3 = vadd.f32 %v126_v62, %v125_v55  ;;  %v94_v9 = vrot.slane %v93_v60, 1  ;;  %v135_v11 = vrot.slane %v134_v4, 4  ;;  %v1323_v54 = vld [vmem:[%s1548_s8 + $0x8] sm:$0xff]  ;;  %v1330_v55 = vld [vmem:[%s1548_s8] sm:$0xff] }
  0x12   :  { %v120_v7 = vadd.f32 %v119_v1, %v118_v58  ;;  %v103_v12 = vrot.slane %v102_v0, 1  ;;  %v143_v14 = vsub.f32 1.0, %v142_v8  ;;  %v77_v18 = vadd.f32 %v76_v5, %v75_v53  ;;  %v1316_v53 = vld [vmem:[%s1548_s8 + $0x10] sm:$0xff]  ;;  %v240_v58 = vld [vmem:[%s1541_s1] sm:$0xff]  ;;  %s1144_s8 = smov [#allocation2]  }
  0x13   :  { %v128_v10 = vrot.slane %v127_v3, 2  ;;  %v112_v13 = vrot.slane %v111_v2, 1  ;;  %v136_v17 = vadd.f32 %v135_v11, %v134_v4  ;;  %v86_v19 = vadd.f32 %v85_v6, %v84_v56  ;;  %411 = vmatpush.msrb.mxu0 %v1316_v53  ;;  %v249_v56 = vld [vmem:[%s1547_s7 + $0x8] sm:$0xff]  ;;  %v1036_v59 = vld [vmem:[%s1544_s4] ss:$0 sm:$0xff] }
  0x14   :  { %v121_v15 = vrot.slane %v120_v7, 1  ;;  %v144_v20 = vmul.f32 %v1042_v48, %v143_v14  ;;  %v95_v21 = vadd.f32 %v94_v9, %v93_v60  ;;  %vm146_vm2 = vweird.f32 %v1042_v48  ;;  %292 = vmatpush.msra.mxu1 %v249_v56  ;;  %1025 = vmatpush.msra.mxu2 %v249_v56  ;;  %v1375_v1 = vld [vmem:[%s1549_s9] ss:$0 sm:$0xff]  ;;  %s1142_s9 = smov 32  }
  0x15   :  { %v129_v16 = vadd.f32 %v128_v10, %v127_v3  ;;  %v137_v23 = vrot.slane %v136_v17, 2  ;;  %v104_v24 = vadd.f32 %v103_v12, %v102_v0  ;;  %v113_v25 = vadd.f32 %v112_v13, %v111_v2  ;;  %412 = vmatpush.msrb.mxu0 %v1323_v54 }
  0x16   :  { %v145_v26 = vadd.f32 %v1042_v48, %v144_v20  ;;  %v122_v27 = vadd.f32 %v121_v15, %v120_v7  ;;  %vm170_vm3 = vcmask 1041409   ;;  %vm172_vm4 = vcmask 1042434   ;;  %293 = vmatpush.msra.mxu1 %v248_v57  ;;  %1026 = vmatpush.msra.mxu2 %v248_v57 }
  0x17   :  { %v130_v22 = vrot.slane %v129_v16, 1  ;;  %v138_v28 = vadd.f32 %v137_v23, %v136_v17  ;;  %vm174_vm5 = vcmask 1043459   ;;  %vm176_vm6 = vcmask 1044484   ;;  %413 = vmatpush.msrb.mxu0 %v1330_v55  ;;  %999 = vmatmul.msk.f32.vlgmr.msra.gmra.mxu1 %vm67_vm0, %v240_v58 }
  0x18   :  { %v147_v30 = vsel %vm146_vm2, %v1042_v48, %v145_v26  ;;  %vm178_vm7 = vcmask 1045509   ;;  %vm180_vm8 = vcmask 1046534   ;;  %vm182_vm9 = vcmask 1047559   ;;  %v210_v48 = vld [vmem:[%s1545_s5 + $0x18] sm:$0xff]  ;;  %481 = vmatpush.msrb.mxu1 %v1311_v52 }
  0x19   :  { %v131_v29 = vadd.f32 %v130_v22, %v129_v16  ;;  %v139_v31 = vrot.slane %v138_v28, 1  ;;  %v148_v32 = vmul.f32 %v147_v30, %v77_v18  ;;  %v149_v33 = vmul.f32 %v147_v30, %v86_v19  ;;  %231 = vmatpush.msra.mxu3 %v210_v48 }
  0x1a   :  { %v150_v34 = vmul.f32 %v147_v30, %v95_v21  ;;  %v151_v35 = vmul.f32 %v147_v30, %v104_v24  ;;  %v152_v36 = vmul.f32 %v147_v30, %v113_v25  ;;  %v153_v38 = vmul.f32 %v147_v30, %v122_v27  ;;  %482 = vmatpush.msrb.mxu1 %v1316_v53  ;;  %v1386_v27 = vld [vmem:[%s1542_s2] sm:$0xff] }
  0x1b   :  { %v140_v37 = vadd.f32 %v139_v31, %v138_v28  ;;  %v171_v39 = vsel %vm170_vm3, %v149_v33, %v148_v32  ;;  %v154_v40 = vmul.f32 %v147_v30, %v131_v29  ;;  %232 = vmatpush.msra.mxu3 %v209_v49  ;;  %vm215_vm10 = vcmask 261120   ;;  %v241_v29 = vld [vmem:[%s1541_s1 + $0x8] sm:$0xff] }
  0x1c   :  { %v173_v41 = vsel %vm172_vm4, %v150_v34, %v171_v39  ;;  %483 = vmatpush.msrb.mxu1 %v1323_v54  ;;  %v1140_v63 = vmov 0.0   ;;  %v1143_v22 = vmov 0   ;;  %vm385_vm15 = vcmp.gt.s32.totalorder %v1386_v27, 0 }
  0x1d   :  { %v155_v42 = vmul.f32 %v147_v30, %v140_v37  ;;  %v175_v43 = vsel %vm174_vm5, %v151_v35, %v173_v41  ;;  %233 = vmatpush.msra.mxu3 %v208_v50  ;;  %1033 = vset.pattern.permute.xlu1 %v1143_v22  ;;  %v386_v28 = vsel %vm385_vm15, 1, %v1143_v22  ;;  %vm456_vm2 = vcmp.gt.s32.totalorder %v1386_v27, 1 }
  0x1e   :  { %v177_v44 = vsel %vm176_vm6, %v152_v36, %v175_v43  ;;  %484 = vmatpush.msrb.mxu1 %v1330_v55  ;;  %1034 = vset.pattern.permute.xlu2 %v1143_v22  ;;  %v457_v43 = vsel %vm456_vm2, 1, %v1143_v22  ;;  %vm598_vm15 = vcmp.gt.s32.totalorder %v1386_v27, 3 }
  0x1f   :  { %v179_v45 = vsel %vm178_vm7, %v153_v38, %v177_v44  ;;  %234 = vmatpush.msra.mxu3 %v207_v51  ;;  %1035 = vset.pattern.permute.xlu0 %v1143_v22 }
  0x20   :  { %v181_v46 = vsel %vm180_vm8, %v154_v40, %v179_v45  ;;  %694 = vmatpush.msra.mxu1 %v1311_v52  ;;  %vm527_vm8 = vcmp.gt.s32.totalorder %v1386_v27, 2 }
  0x21   :  { %v183_v47 = vsel %vm182_vm9, %v155_v42, %v181_v46  ;;  %339 = vmatpush.msrb.mxu3 %v1311_v52  ;;  %1000 = vmatmul.msk.f32.gmra.mxu1 %vm67_vm0, %v241_v29 }
  0x22   :  { %997 = vmatmul.msk.f32.vlgmr.msra.gmra.mxu0 %vm67_vm0, %v183_v47  ;;  %695 = vmatpush.msra.mxu1 %v1316_v53 }
  0x23   :  { %340 = vmatpush.msrb.mxu3 %v1316_v53  ;;  %623 = vmatpush.msra.mxu0 %v1311_v52 }
  0x24   :  { %696 = vmatpush.msra.mxu1 %v1323_v54 }
  0x25   :  { %341 = vmatpush.msrb.mxu3 %v1323_v54  ;;  %624 = vmatpush.msra.mxu0 %v1316_v53 }
  0x26   :  { %697 = vmatpush.msra.mxu1 %v1330_v55 }
  0x27   :  { %342 = vmatpush.msrb.mxu3 %v1330_v55  ;;  %625 = vmatpush.msra.mxu0 %v1323_v54 }
  0x29   :  { %626 = vmatpush.msra.mxu0 %v1330_v55 }
  0x94   :  { %v295_v2 = vpop.f32.mrf.mxu1 }
  0x95   :  { %v296_v3 = vadd.f32 %v1375_v1, %v295_v2 }
  0x9e   :  { %v298_v35 = vpop.f32.mrf.mxu1 }
  0x9f   :  { %v203_v60 = vpop.f32.mrf.mxu0  ;;  %v299_v36 = vadd.f32 %v1375_v1, %v298_v35 }
  0xa0   :  { %v204_v61 = vadd.f32 %v1036_v59, %v203_v60 }
  0xa2   :  { %1043 = vtanh.f32 %v204_v61  ;;  %v242_v61 = vld [vmem:[%s1541_s1 + $0x10] sm:$0xff] }
  0xa3   :  { %1001 = vmatmul.msk.f32.vlgmr.msra.gmra.mxu2 %vm67_vm0, %v242_v61 }
  0xa8   :  { %v1044_v62 = vpop.eup %1043 }
  0xa9   :  { %998 = vmatmul.msk.f32.vlgmr.msra.gmra.mxu3 %vm215_vm10, %v1044_v62 }
  0xaa   :  { %552 = vmatpush.msra.mxu3 %v1311_v52 }
  0xac   :  { %553 = vmatpush.msra.mxu3 %v1316_v53 }
  0xae   :  { %554 = vmatpush.msra.mxu3 %v1323_v54 }
  0xb0   :  { %555 = vmatpush.msra.mxu3 %v1330_v55 }
  0xb1   :  { %343 = vmatmul.f32.vlgmr.msrb.gmra.mxu3 %v1140_v63 }
  0xb2   :  { %765 = vmatpush.msrb.mxu3 %v1311_v52 }
  0xb4   :  { %766 = vmatpush.msrb.mxu3 %v1316_v53 }
  0xb6   :  { %767 = vmatpush.msrb.mxu3 %v1323_v54 }
  0xb8   :  { %768 = vmatpush.msrb.mxu3 %v1330_v55 }
 0x12c   :  { %v1370_v0 = vpop.f32.mrf.mxu3 }
 0x134   :  { %v344_v4 = vpop.f32.mrf.mxu3 }
 0x135   :  { %v347_v5 = vadd.f32 %v344_v4, %v296_v3 }
 0x137   :  { %1045 = vtanh.f32 %v347_v5  ;;  %v1007_v7 = vmul.f32 -1.442695, %v347_v5  ;;  %v301_v5 = vpop.f32.mrf.mxu2 }
 0x139   :  { %1047 = vpow2.f32 %v1007_v7 }
 0x13d   :  { %v1046_v6 = vpop.eup %1045 }
 0x13e   :  { %370 = vrot.lane.b32.xlu0 %v1046_v6, %s1141_s26  ;;  %v302_v6 = vadd.f32 %v1375_v1, %v301_v5 }
 0x13f   :  { %v1048_v8 = vpop.eup %1047 }
 0x140   :  { %v351_v9 = vadd.f32 1.0, %v1048_v8 }
 0x142   :  { %1049 = vrcp.f32 %v351_v9  ;;  %v363_v15 = vand.u32 2147483648, %v351_v9  ;;  %vm357_vm12 = vweird.f32 %v351_v9  ;;  %v361_v16 = vand.u32 2147483647, %v351_v9 }
 0x144   :  { %v364_v18 = vor.u32 1.1754944e-38, %v363_v15  ;;  %vm362_vm14 = vcmp.eq.f32.partialorder %v361_v16, 8.507059e+37 }
 0x148   :  { %v1050_v10 = vpop.eup %1049 }
 0x149   :  { %v353_v11 = vmul.f32 %v1050_v10, %v351_v9  ;;  %vm358_vm11 = vweird.f32 %v1050_v10 }
 0x14a   :  { %vm359_vm13 = vmor %vm357_vm12, %vm358_vm11 }
 0x14b   :  { %v354_v12 = vsub.f32 1.0, %v353_v11 }
 0x14d   :  { %v355_v13 = vmul.f32 %v1050_v10, %v354_v12 }
 0x14f   :  { %v356_v14 = vadd.f32 %v1050_v10, %v355_v13 }
 0x151   :  { %v360_v17 = vsel %vm359_vm13, %v1050_v10, %v356_v14  ;;  %v528_v10 = vsel %vm527_vm8, 1, %v1143_v22 }
 0x152   :  { %v365_v20 = vsel %vm362_vm14, %v364_v18, %v360_v17 }
 0x153   :  { %v368_v23 = vmul.f32 0.0, %v365_v20 }
 0x1b0   :  { %v371_v19 = vpop.permute.xlu0 %370 }
 0x1b1   :  { %v373_v21 = vmul.f32 %v371_v19, %v365_v20 }
 0x1b3   :  { %375 = vrot.lane.b32.xlu0 %v373_v21, %s1142_s9 }
 0x225   :  { %v376_v24 = vpop.permute.xlu0 %375 }
 0x226   :  { %v378_v25 = vadd.f32 %v376_v24, %v368_v23 }
 0x228   :  { %1051 = vtanh.f32 %v378_v25 }
 0x22e   :  { %v1052_v26 = vpop.eup %1051 }
 0x22f   :  { %381 = vrot.lane.b32.xlu1 %v1052_v26, %s1141_s26 }
 0x237   :  { %388 = vperm.xlu1 %1033, %v386_v28  }
 0x2a1   :  { %v382_v30 = vpop.permute.xlu1 %381 }
 0x2a2   :  { %v384_v31 = vmul.f32 %v382_v30, %v365_v20 }
 0x2a9   :  { %v389_v32 = vpop.permute.xlu1 %388 }
 0x2aa   :  { %vm390_vm1 = vcmp.eq.s32.totalorder %v389_v32, 1 }
 0x2ab   :  { %v391_v33 = vsel %vm390_vm1, %v384_v31, 0.0  ;;  %v392_v56 = vsel %vm390_vm1, %v378_v25, 0.0  ;;  %vm669_vm1 = vcmp.gt.s32.totalorder %v1386_v27, 4 }
 0x2ac   :  { %394 = vrot.lane.b32.xlu2 %v391_v33, %s1142_s9 }
 0x306   :  { %v395_v34 = vpop.permute.xlu2 %394 }
 0x307   :  { %1008 = vmatmul.msk.f32.vlgmr.msrb.gmra.mxu0 %vm215_vm10, %v395_v34 }
 0x308   :  { %836 = vmatpush.msrb.mxu0 %v1311_v52 }
 0x30a   :  { %837 = vmatpush.msrb.mxu0 %v1316_v53 }
 0x30c   :  { %838 = vmatpush.msrb.mxu0 %v1323_v54 }
 0x30e   :  { %839 = vmatpush.msrb.mxu0 %v1330_v55 }
 0x384   :  { %v415_v37 = vpop.f32.mrf.mxu0 }
 0x385   :  { %v418_v38 = vadd.f32 %v415_v37, %v299_v36 }
 0x387   :  { %1053 = vtanh.f32 %v418_v38  ;;  %v1009_v40 = vmul.f32 -1.442695, %v418_v38 }
 0x389   :  { %1055 = vpow2.f32 %v1009_v40 }
 0x38d   :  { %v1054_v39 = vpop.eup %1053 }
 0x38e   :  { %441 = vrot.lane.b32.xlu2 %v1054_v39, %s1141_s26 }
 0x38f   :  { %v1056_v41 = vpop.eup %1055 }
 0x390   :  { %v422_v42 = vadd.f32 1.0, %v1056_v41 }
 0x392   :  { %1057 = vrcp.f32 %v422_v42  ;;  %v434_v49 = vand.u32 2147483648, %v422_v42  ;;  %vm428_vm4 = vweird.f32 %v422_v42  ;;  %v432_v50 = vand.u32 2147483647, %v422_v42 }
 0x394   :  { %v435_v52 = vor.u32 1.1754944e-38, %v434_v49  ;;  %vm433_vm6 = vcmp.eq.f32.partialorder %v432_v50, 8.507059e+37 }
 0x396   :  { %459 = vperm.xlu2 %1034, %v457_v43  }
 0x398   :  { %v1058_v44 = vpop.eup %1057 }
 0x399   :  { %v424_v45 = vmul.f32 %v1058_v44, %v422_v42  ;;  %vm429_vm3 = vweird.f32 %v1058_v44 }
 0x39a   :  { %vm430_vm5 = vmor %vm428_vm4, %vm429_vm3 }
 0x39b   :  { %v425_v46 = vsub.f32 1.0, %v424_v45 }
 0x39d   :  { %v426_v47 = vmul.f32 %v1058_v44, %v425_v46 }
 0x39f   :  { %v427_v48 = vadd.f32 %v1058_v44, %v426_v47  ;;  %v599_v47 = vsel %vm598_vm15, 1, %v1143_v22 }
 0x3a1   :  { %v431_v51 = vsel %vm430_vm5, %v1058_v44, %v427_v48  ;;  %v670_v48 = vsel %vm669_vm1, 1, %v1143_v22 }
 0x3a2   :  { %v436_v54 = vsel %vm433_vm6, %v435_v52, %v431_v51 }
 0x3a3   :  { %v439_v57 = vmul.f32 %v436_v54, %v392_v56 }
 0x3e8   :  { %v442_v53 = vpop.permute.xlu2 %441 }
 0x3e9   :  { %v444_v55 = vmul.f32 %v442_v53, %v436_v54 }
 0x3eb   :  { %446 = vrot.lane.b32.xlu0 %v444_v55, %s1142_s9 }
 0x3f0   :  { %v460_v62 = vpop.permute.xlu2 %459 }
 0x3f1   :  { %vm461_vm7 = vcmp.eq.s32.totalorder %v460_v62, 1 }
 0x45d   :  { %v447_v58 = vpop.permute.xlu0 %446 }
 0x45e   :  { %v449_v59 = vadd.f32 %v447_v58, %v439_v57 }
 0x460   :  { %1059 = vtanh.f32 %v449_v59  ;;  %v463_v28 = vsel %vm461_vm7, %v449_v59, %v392_v56 }
 0x466   :  { %v1060_v60 = vpop.eup %1059 }
 0x467   :  { %452 = vrot.lane.b32.xlu1 %v1060_v60, %s1141_s26 }
 0x4d9   :  { %v453_v63 = vpop.permute.xlu1 %452 }
 0x4da   :  { %v455_v2 = vmul.f32 %v453_v63, %v436_v54 }
 0x4dc   :  { %v462_v3 = vsel %vm461_vm7, %v455_v2, %v391_v33  ;;  %v243_v33 = vld [vmem:[%s1541_s1 + $0x18] sm:$0xff] }
 0x4dd   :  { %465 = vrot.lane.b32.xlu0 %v462_v3, %s1142_s9  ;;  %1002 = vmatmul.msk.f32.gmra.mxu2 %vm67_vm0, %v243_v33 }
 0x54f   :  { %v466_v4 = vpop.permute.xlu0 %465 }
 0x550   :  { %1010 = vmatmul.msk.f32.vlgmr.msrb.gmra.mxu1 %vm215_vm10, %v466_v4  ;;  %v244_v4 = vld [vmem:[%s1541_s1 + $0x20] sm:$0xff] }
 0x551   :  { %1003 = vmatmul.msk.f32.gmra.mxu2 %vm67_vm0, %v244_v4 }
 0x560   :  { %v304_v39 = vpop.f32.mrf.mxu2 }
 0x561   :  { %v305_v40 = vadd.f32 %v1375_v1, %v304_v39 }
 0x5cd   :  { %v486_v7 = vpop.f32.mrf.mxu1 }
 0x5ce   :  { %v489_v8 = vadd.f32 %v486_v7, %v302_v6 }
 0x5d0   :  { %1061 = vtanh.f32 %v489_v8  ;;  %v1011_v11 = vmul.f32 -1.442695, %v489_v8 }
 0x5d2   :  { %1063 = vpow2.f32 %v1011_v11 }
 0x5d6   :  { %v1062_v9 = vpop.eup %1061 }
 0x5d7   :  { %512 = vrot.lane.b32.xlu1 %v1062_v9, %s1141_s26 }
 0x5d8   :  { %v1064_v12 = vpop.eup %1063 }
 0x5d9   :  { %v493_v13 = vadd.f32 1.0, %v1064_v12 }
 0x5db   :  { %1065 = vrcp.f32 %v493_v13  ;;  %v505_v19 = vand.u32 2147483648, %v493_v13  ;;  %vm499_vm11 = vweird.f32 %v493_v13  ;;  %v503_v20 = vand.u32 2147483647, %v493_v13 }
 0x5dd   :  { %v506_v23 = vor.u32 1.1754944e-38, %v505_v19  ;;  %vm504_vm13 = vcmp.eq.f32.partialorder %v503_v20, 8.507059e+37 }
 0x5df   :  { %530 = vperm.xlu1 %1033, %v528_v10   ;;  %v307_v10 = vpop.f32.mrf.mxu2 }
 0x5e0   :  { %v308_v11 = vadd.f32 %v1375_v1, %v307_v10 }
 0x5e1   :  { %v1066_v14 = vpop.eup %1065 }
 0x5e2   :  { %v495_v15 = vmul.f32 %v1066_v14, %v493_v13  ;;  %vm500_vm9 = vweird.f32 %v1066_v14 }
 0x5e3   :  { %vm501_vm12 = vmor %vm499_vm11, %vm500_vm9 }
 0x5e4   :  { %v496_v16 = vsub.f32 1.0, %v495_v15 }
 0x5e6   :  { %v497_v17 = vmul.f32 %v1066_v14, %v496_v16 }
 0x5e8   :  { %v498_v18 = vadd.f32 %v1066_v14, %v497_v17 }
 0x5ea   :  { %v502_v21 = vsel %vm501_vm12, %v1066_v14, %v498_v18 }
 0x5eb   :  { %v507_v25 = vsel %vm504_vm13, %v506_v23, %v502_v21  ;;  %vm740_vm13 = vcmp.gt.s32.totalorder %v1386_v27, 5 }
 0x5ec   :  { %v510_v29 = vmul.f32 %v507_v25, %v463_v28 }
 0x649   :  { %v513_v24 = vpop.permute.xlu1 %512 }
 0x64a   :  { %v515_v26 = vmul.f32 %v513_v24, %v507_v25 }
 0x64c   :  { %517 = vrot.lane.b32.xlu2 %v515_v26, %s1142_s9 }
 0x651   :  { %v531_v34 = vpop.permute.xlu1 %530 }
 0x652   :  { %vm532_vm14 = vcmp.eq.s32.totalorder %v531_v34, 1 }
 0x6a6   :  { %v518_v30 = vpop.permute.xlu2 %517 }
 0x6a7   :  { %v520_v31 = vadd.f32 %v518_v30, %v510_v29 }
 0x6a9   :  { %1067 = vtanh.f32 %v520_v31  ;;  %v534_v61 = vsel %vm532_vm14, %v520_v31, %v463_v28 }
 0x6af   :  { %v1068_v32 = vpop.eup %1067 }
 0x6b0   :  { %523 = vrot.lane.b32.xlu0 %v1068_v32, %s1141_s26 }
 0x722   :  { %v524_v35 = vpop.permute.xlu0 %523 }
 0x723   :  { %v526_v36 = vmul.f32 %v524_v35, %v507_v25 }
 0x725   :  { %v533_v37 = vsel %vm532_vm14, %v526_v36, %v462_v3 }
 0x726   :  { %536 = vrot.lane.b32.xlu2 %v533_v37, %s1142_s9 }
 0x780   :  { %v537_v38 = vpop.permute.xlu2 %536 }
 0x781   :  { %1012 = vmatmul.msk.f32.vlgmr.msra.gmra.mxu3 %vm215_vm10, %v537_v38 }
 0x804   :  { %v557_v41 = vpop.f32.mrf.mxu3 }
 0x805   :  { %v560_v42 = vadd.f32 %v557_v41, %v305_v40 }
 0x807   :  { %1069 = vtanh.f32 %v560_v42  ;;  %v1013_v44 = vmul.f32 -1.442695, %v560_v42 }
 0x809   :  { %1071 = vpow2.f32 %v1013_v44 }
 0x80d   :  { %v1070_v43 = vpop.eup %1069 }
 0x80e   :  { %583 = vrot.lane.b32.xlu0 %v1070_v43, %s1141_s26 }
 0x80f   :  { %v1072_v45 = vpop.eup %1071 }
 0x810   :  { %v564_v46 = vadd.f32 1.0, %v1072_v45 }
 0x812   :  { %1073 = vrcp.f32 %v564_v46  ;;  %v576_v54 = vand.u32 2147483648, %v564_v46  ;;  %vm570_vm3 = vweird.f32 %v564_v46  ;;  %v574_v55 = vand.u32 2147483647, %v564_v46 }
 0x814   :  { %v577_v57 = vor.u32 1.1754944e-38, %v576_v54  ;;  %vm575_vm5 = vcmp.eq.f32.partialorder %v574_v55, 8.507059e+37 }
 0x816   :  { %601 = vperm.xlu0 %1035, %v599_v47  }
 0x818   :  { %v1074_v49 = vpop.eup %1073 }
 0x819   :  { %v566_v50 = vmul.f32 %v1074_v49, %v564_v46  ;;  %vm571_vm2 = vweird.f32 %v1074_v49 }
 0x81a   :  { %vm572_vm4 = vmor %vm570_vm3, %vm571_vm2 }
 0x81b   :  { %v567_v51 = vsub.f32 1.0, %v566_v50 }
 0x81d   :  { %v568_v52 = vmul.f32 %v1074_v49, %v567_v51 }
 0x81e   :  { %672 = vperm.xlu0 %1035, %v670_v48   ;;  %v741_v48 = vsel %vm740_vm13, 1, %v1143_v22 }
 0x81f   :  { %v569_v53 = vadd.f32 %v1074_v49, %v568_v52 }
 0x821   :  { %v573_v56 = vsel %vm572_vm4, %v1074_v49, %v569_v53  ;;  %vm811_vm4 = vcmp.gt.s32.totalorder %v1386_v27, 6 }
 0x822   :  { %v578_v59 = vsel %vm575_vm5, %v577_v57, %v573_v56 }
 0x823   :  { %v581_v62 = vmul.f32 %v578_v59, %v534_v61 }
 0x880   :  { %v584_v58 = vpop.permute.xlu0 %583 }
 0x881   :  { %v586_v60 = vmul.f32 %v584_v58, %v578_v59 }
 0x883   :  { %588 = vrot.lane.b32.xlu1 %v586_v60, %s1142_s9 }
 0x888   :  { %v602_v5 = vpop.permute.xlu0 %601 }
 0x889   :  { %vm603_vm6 = vcmp.eq.s32.totalorder %v602_v5, 1 }
 0x890   :  { %v673_v38 = vpop.permute.xlu0 %672 }
 0x891   :  { %vm674_vm12 = vcmp.eq.s32.totalorder %v673_v38, 1 }
 0x8f5   :  { %v589_v63 = vpop.permute.xlu1 %588 }
 0x8f6   :  { %v591_v2 = vadd.f32 %v589_v63, %v581_v62 }
 0x8f8   :  { %1075 = vtanh.f32 %v591_v2  ;;  %v605_v32 = vsel %vm603_vm6, %v591_v2, %v534_v61 }
 0x8fe   :  { %v1076_v3 = vpop.eup %1075 }
 0x8ff   :  { %594 = vrot.lane.b32.xlu2 %v1076_v3, %s1141_s26 }
 0x959   :  { %v595_v6 = vpop.permute.xlu2 %594 }
 0x95a   :  { %v597_v7 = vmul.f32 %v595_v6, %v578_v59 }
 0x95c   :  { %v604_v8 = vsel %vm603_vm6, %v597_v7, %v533_v37  ;;  %v245_v37 = vld [vmem:[%s1541_s1 + $0x28] sm:$0xff]  ;;  %v246_v7 = vld [vmem:[%s1541_s1 + $0x30] sm:$0xff] }
 0x95d   :  { %607 = vrot.lane.b32.xlu1 %v604_v8, %s1142_s9  ;;  %1004 = vmatmul.msk.f32.gmra.mxu2 %vm67_vm0, %v245_v37 }
 0x965   :  { %1005 = vmatmul.msk.f32.gmra.mxu2 %vm67_vm0, %v246_v7 }
 0x9cf   :  { %v608_v9 = vpop.permute.xlu1 %607 }
 0x9d0   :  { %1014 = vmatmul.msk.f32.vlgmr.msra.gmra.mxu0 %vm215_vm10, %v608_v9 }
 0x9e0   :  { %v310_v43 = vpop.f32.mrf.mxu2 }
 0x9e1   :  { %v311_v44 = vadd.f32 %v1375_v1, %v310_v43 }
 0xa4d   :  { %v628_v12 = vpop.f32.mrf.mxu0 }
 0xa4e   :  { %v631_v13 = vadd.f32 %v628_v12, %v308_v11  ;;  %v890_v12 = vld [vmem:[%s1550_s10 + $0x8] sm:$0xff] }
 0xa4f   :  { %937 = vmatpush.msra.mxu3 %v890_v12  ;;  %v894_v12 = vld [vmem:[%s1551_s11 + $0x18] sm:$0xff] }
 0xa50   :  { %1077 = vtanh.f32 %v631_v13  ;;  %v1015_v15 = vmul.f32 -1.442695, %v631_v13  ;;  %v889_v13 = vld [vmem:[%s1550_s10] sm:$0xff]  ;;  %912 = vmatpush.msrb.mxu1 %v894_v12 }
 0xa51   :  { %938 = vmatpush.msra.mxu3 %v889_v13  ;;  %v893_v13 = vld [vmem:[%s1551_s11 + $0x10] sm:$0xff] }
 0xa52   :  { %1079 = vpow2.f32 %v1015_v15  ;;  %913 = vmatpush.msrb.mxu1 %v893_v13 }
 0xa56   :  { %v1078_v14 = vpop.eup %1077 }
 0xa57   :  { %654 = vrot.lane.b32.xlu2 %v1078_v14, %s1141_s26  ;;  %v1037_v14 = vld [vmem:[%s1546_s6] ss:$0 sm:$0xff] }
 0xa58   :  { %v1080_v16 = vpop.eup %1079  ;;  %v237_v15 = vadd.f32 %v1037_v14, %v1370_v0  ;;  %v812_v0 = vsel %vm811_vm4, 1, %v1143_v22  ;;  %v892_v14 = vld [vmem:[%s1551_s11 + $0x8] sm:$0xff] }
 0xa59   :  { %v635_v17 = vadd.f32 1.0, %v1080_v16  ;;  %914 = vmatpush.msrb.mxu1 %v892_v14 }
 0xa5b   :  { %1081 = vrcp.f32 %v635_v17  ;;  %v647_v24 = vand.u32 2147483648, %v635_v17  ;;  %vm641_vm8 = vweird.f32 %v635_v17  ;;  %v645_v25 = vand.u32 2147483647, %v635_v17 }
 0xa5d   :  { %v648_v28 = vor.u32 1.1754944e-38, %v647_v24  ;;  %vm646_vm11 = vcmp.eq.f32.partialorder %v645_v25, 8.507059e+37 }
 0xa61   :  { %v1082_v18 = vpop.eup %1081 }
 0xa62   :  { %v637_v19 = vmul.f32 %v1082_v18, %v635_v17  ;;  %vm642_vm7 = vweird.f32 %v1082_v18 }
 0xa63   :  { %vm643_vm9 = vmor %vm641_vm8, %vm642_vm7 }
 0xa64   :  { %v638_v20 = vsub.f32 1.0, %v637_v19 }
 0xa66   :  { %v639_v21 = vmul.f32 %v1082_v18, %v638_v20 }
 0xa68   :  { %v640_v23 = vadd.f32 %v1082_v18, %v639_v21 }
 0xa6a   :  { %v644_v26 = vsel %vm643_vm9, %v1082_v18, %v640_v23  ;;  %v313_v18 = vpop.f32.mrf.mxu2 }
 0xa6b   :  { %v649_v30 = vsel %vm646_vm11, %v648_v28, %v644_v26  ;;  %v314_v19 = vadd.f32 %v1375_v1, %v313_v18 }
 0xa6c   :  { %v652_v33 = vmul.f32 %v649_v30, %v605_v32 }
 0xab1   :  { %v655_v29 = vpop.permute.xlu2 %654 }
 0xab2   :  { %v657_v31 = vmul.f32 %v655_v29, %v649_v30 }
 0xab4   :  { %659 = vrot.lane.b32.xlu1 %v657_v31, %s1142_s9 }
 0xb26   :  { %v660_v34 = vpop.permute.xlu1 %659 }
 0xb27   :  { %v662_v35 = vadd.f32 %v660_v34, %v652_v33 }
 0xb29   :  { %1083 = vtanh.f32 %v662_v35  ;;  %v676_v2 = vsel %vm674_vm12, %v662_v35, %v605_v32 }
 0xb2f   :  { %v1084_v36 = vpop.eup %1083 }
 0xb30   :  { %665 = vrot.lane.b32.xlu2 %v1084_v36, %s1141_s26 }
 0xb8a   :  { %v666_v39 = vpop.permute.xlu2 %665 }
 0xb8b   :  { %v668_v40 = vmul.f32 %v666_v39, %v649_v30 }
 0xb8d   :  { %v675_v41 = vsel %vm674_vm12, %v668_v40, %v604_v8 }
 0xb8e   :  { %678 = vrot.lane.b32.xlu1 %v675_v41, %s1142_s9 }
 0xc00   :  { %v679_v42 = vpop.permute.xlu1 %678 }
 0xc01   :  { %1016 = vmatmul.msk.f32.vlgmr.msra.gmra.mxu1 %vm215_vm10, %v679_v42 }
 0xc7e   :  { %v699_v45 = vpop.f32.mrf.mxu1 }
 0xc7f   :  { %v702_v46 = vadd.f32 %v699_v45, %v311_v44  ;;  %v247_v45 = vld [vmem:[%s1541_s1 + $0x38] sm:$0xff] }
 0xc80   :  { %1006 = vmatmul.msk.f32.gmra.mxu2 %vm67_vm0, %v247_v45 }
 0xc81   :  { %1085 = vtanh.f32 %v702_v46  ;;  %v1017_v49 = vmul.f32 -1.442695, %v702_v46 }
 0xc83   :  { %1087 = vpow2.f32 %v1017_v49 }
 0xc87   :  { %v1086_v47 = vpop.eup %1085 }
 0xc88   :  { %725 = vrot.lane.b32.xlu2 %v1086_v47, %s1141_s26 }
 0xc89   :  { %v1088_v50 = vpop.eup %1087 }
 0xc8a   :  { %v706_v51 = vadd.f32 1.0, %v1088_v50 }
 0xc8c   :  { %1089 = vrcp.f32 %v706_v51  ;;  %v718_v57 = vand.u32 2147483648, %v706_v51  ;;  %vm712_vm15 = vweird.f32 %v706_v51  ;;  %v716_v58 = vand.u32 2147483647, %v706_v51 }
 0xc8e   :  { %v719_v60 = vor.u32 1.1754944e-38, %v718_v57  ;;  %vm717_vm2 = vcmp.eq.f32.partialorder %v716_v58, 8.507059e+37 }
 0xc90   :  { %743 = vperm.xlu2 %1034, %v741_v48  }
 0xc92   :  { %v1090_v52 = vpop.eup %1089 }
 0xc93   :  { %v708_v53 = vmul.f32 %v1090_v52, %v706_v51  ;;  %vm713_vm14 = vweird.f32 %v1090_v52 }
 0xc94   :  { %vm714_vm1 = vmor %vm712_vm15, %vm713_vm14 }
 0xc95   :  { %v709_v54 = vsub.f32 1.0, %v708_v53 }
 0xc97   :  { %v710_v55 = vmul.f32 %v1090_v52, %v709_v54 }
 0xc99   :  { %v711_v56 = vadd.f32 %v1090_v52, %v710_v55 }
 0xc9b   :  { %v715_v59 = vsel %vm714_vm1, %v1090_v52, %v711_v56 }
 0xc9c   :  { %v720_v62 = vsel %vm717_vm2, %v719_v60, %v715_v59 }
 0xc9d   :  { %v723_v3 = vmul.f32 %v720_v62, %v676_v2 }
 0xce2   :  { %v726_v61 = vpop.permute.xlu2 %725 }
 0xce3   :  { %v728_v63 = vmul.f32 %v726_v61, %v720_v62 }
 0xce5   :  { %730 = vrot.lane.b32.xlu0 %v728_v63, %s1142_s9 }
 0xcea   :  { %v744_v8 = vpop.permute.xlu2 %743 }
 0xceb   :  { %vm745_vm3 = vcmp.eq.s32.totalorder %v744_v8, 1 }
 0xd03   :  { %v316_v51 = vpop.f32.mrf.mxu2 }
 0xd04   :  { %v317_v52 = vadd.f32 %v1375_v1, %v316_v51 }
 0xd57   :  { %v731_v4 = vpop.permute.xlu0 %730 }
 0xd58   :  { %v733_v5 = vadd.f32 %v731_v4, %v723_v3 }
 0xd5a   :  { %1091 = vtanh.f32 %v733_v5  ;;  %v747_v40 = vsel %vm745_vm3, %v733_v5, %v676_v2 }
 0xd5b   :  { %1093 = vtanh.f32 %v237_v15  ;;  %v891_v15 = vld [vmem:[%s1551_s11] sm:$0xff] }
 0xd5c   :  { %915 = vmatpush.msrb.mxu1 %v891_v15 }
 0xd60   :  { %v1092_v6 = vpop.eup %1091 }
 0xd61   :  { %736 = vrot.lane.b32.xlu1 %v1092_v6, %s1141_s26  ;;  %v1094_v17 = vpop.eup %1093 }
 0xdd3   :  { %v737_v9 = vpop.permute.xlu1 %736 }
 0xdd4   :  { %v739_v10 = vmul.f32 %v737_v9, %v720_v62 }
 0xdd6   :  { %v746_v11 = vsel %vm745_vm3, %v739_v10, %v675_v41 }
 0xdd7   :  { %749 = vrot.lane.b32.xlu0 %v746_v11, %s1142_s9 }
 0xe49   :  { %v750_v16 = vpop.permute.xlu0 %749 }
 0xe4a   :  { %1018 = vmatmul.msk.f32.vlgmr.msrb.gmra.mxu3 %vm215_vm10, %v750_v16 }
 0xe52   :  { %1023 = vmatmul.msk.f32.vlgmr.msra.gmra.mxu3 %vm67_vm0, %v1094_v17  ;;  %vm882_vm0 = vcmp.gt.s32.totalorder %v1386_v27, 7 }
 0xe53   :  { %v883_v56 = vsel %vm882_vm0, 1, %v1143_v22 }
 0xecd   :  { %v770_v20 = vpop.f32.mrf.mxu3 }
 0xece   :  { %v773_v21 = vadd.f32 %v770_v20, %v314_v19 }
 0xed0   :  { %1095 = vtanh.f32 %v773_v21  ;;  %v1019_v24 = vmul.f32 -1.442695, %v773_v21  ;;  %v952_v21 = vld [vmem:[%s1553_s13 + $0x18] sm:$0xff] }
 0xed1   :  { %972 = vmatpush.msra.mxu0 %v952_v21 }
 0xed2   :  { %1097 = vpow2.f32 %v1019_v24  ;;  %v949_v24 = vld [vmem:[%s1553_s13] sm:$0xff] }
 0xed6   :  { %v1096_v23 = vpop.eup %1095 }
 0xed7   :  { %796 = vrot.lane.b32.xlu1 %v1096_v23, %s1141_s26  ;;  %v951_v23 = vld [vmem:[%s1553_s13 + $0x10] sm:$0xff] }
 0xed8   :  { %v1098_v25 = vpop.eup %1097  ;;  %973 = vmatpush.msra.mxu0 %v951_v23 }
 0xed9   :  { %v777_v26 = vadd.f32 1.0, %v1098_v25  ;;  %v1039_v25 = vld [vmem:[%s1552_s12] ss:$0 sm:$0xff] }
 0xedb   :  { %1099 = vrcp.f32 %v777_v26  ;;  %v789_v33 = vand.u32 2147483648, %v777_v26  ;;  %vm783_vm6 = vweird.f32 %v777_v26  ;;  %v787_v34 = vand.u32 2147483647, %v777_v26 }
 0xedd   :  { %v790_v36 = vor.u32 1.1754944e-38, %v789_v33  ;;  %vm788_vm8 = vcmp.eq.f32.partialorder %v787_v34, 8.507059e+37 }
 0xedf   :  { %814 = vperm.xlu1 %1033, %v812_v0   ;;  %v950_v0 = vld [vmem:[%s1553_s13 + $0x8] sm:$0xff]  ;;  %s986_s13 = sshll.u32 %s1144_s8, 4  ;;  %s987_s13 = int_to_ptr.vmem [resolvable:$true] %s986_s13 }
 0xee0   :  { %974 = vmatpush.msra.mxu0 %v950_v0 }
 0xee1   :  { %v1100_v28 = vpop.eup %1099 }
 0xee2   :  { %v779_v29 = vmul.f32 %v1100_v28, %v777_v26  ;;  %vm784_vm5 = vweird.f32 %v1100_v28  ;;  %975 = vmatpush.msra.mxu0 %v949_v24  ;;  %v940_v26 = vpop.f32.mrf.mxu3 }
 0xee3   :  { %vm785_vm7 = vmor %vm783_vm6, %vm784_vm5 }
 0xee4   :  { %v780_v30 = vsub.f32 1.0, %v779_v29 }
 0xee6   :  { %v781_v31 = vmul.f32 %v1100_v28, %v780_v30 }
 0xee8   :  { %v782_v32 = vadd.f32 %v1100_v28, %v781_v31 }
 0xeea   :  { %v786_v35 = vsel %vm785_vm7, %v1100_v28, %v782_v32  ;;  %v1040_v32 = vld [vmem:[%s1554_s14] ss:$0 sm:$0xff] }
 0xeeb   :  { %v791_v38 = vsel %vm788_vm8, %v790_v36, %v786_v35 }
 0xeec   :  { %v794_v41 = vmul.f32 %v791_v38, %v747_v40 }
 0xf49   :  { %v797_v37 = vpop.permute.xlu1 %796 }
 0xf4a   :  { %v799_v39 = vmul.f32 %v797_v37, %v791_v38 }
 0xf4c   :  { %801 = vrot.lane.b32.xlu2 %v799_v39, %s1142_s9 }
 0xf51   :  { %v815_v46 = vpop.permute.xlu1 %814 }
 0xf52   :  { %vm816_vm9 = vcmp.eq.s32.totalorder %v815_v46, 1 }
 0xfa6   :  { %v802_v42 = vpop.permute.xlu2 %801 }
 0xfa7   :  { %v804_v43 = vadd.f32 %v802_v42, %v794_v41 }
 0xfa9   :  { %1101 = vtanh.f32 %v804_v43  ;;  %v818_v7 = vsel %vm816_vm9, %v804_v43, %v747_v40 }
 0xfaf   :  { %v1102_v44 = vpop.eup %1101 }
 0xfb0   :  { %807 = vrot.lane.b32.xlu0 %v1102_v44, %s1141_s26 }
0x1022   :  { %v808_v47 = vpop.permute.xlu0 %807 }
0x1023   :  { %v810_v48 = vmul.f32 %v808_v47, %v791_v38 }
0x1025   :  { %v817_v49 = vsel %vm816_vm9, %v810_v48, %v746_v11 }
0x1026   :  { %820 = vrot.lane.b32.xlu2 %v817_v49, %s1142_s9 }
0x1080   :  { %v821_v50 = vpop.permute.xlu2 %820 }
0x1081   :  { %1020 = vmatmul.msk.f32.vlgmr.msrb.gmra.mxu0 %vm215_vm10, %v821_v50 }
0x10fe   :  { %v841_v53 = vpop.f32.mrf.mxu0 }
0x10ff   :  { %v844_v54 = vadd.f32 %v841_v53, %v317_v52 }
0x1101   :  { %1103 = vtanh.f32 %v844_v54  ;;  %v1021_v57 = vmul.f32 -1.442695, %v844_v54 }
0x1103   :  { %1105 = vpow2.f32 %v1021_v57 }
0x1107   :  { %v1104_v55 = vpop.eup %1103 }
0x1108   :  { %867 = vrot.lane.b32.xlu0 %v1104_v55, %s1141_s26 }
0x1109   :  { %v1106_v58 = vpop.eup %1105 }
0x110a   :  { %v848_v59 = vadd.f32 1.0, %v1106_v58 }
0x110c   :  { %1107 = vrcp.f32 %v848_v59  ;;  %v860_v2 = vand.u32 2147483648, %v848_v59  ;;  %vm854_vm12 = vweird.f32 %v848_v59  ;;  %v858_v3 = vand.u32 2147483647, %v848_v59 }
0x110e   :  { %v861_v27 = vor.u32 1.1754944e-38, %v860_v2  ;;  %vm859_vm14 = vcmp.eq.f32.partialorder %v858_v3, 8.507059e+37 }
0x1110   :  { %885 = vperm.xlu0 %1035, %v883_v56  }
0x1112   :  { %v1108_v60 = vpop.eup %1107 }
0x1113   :  { %v850_v61 = vmul.f32 %v1108_v60, %v848_v59  ;;  %vm855_vm11 = vweird.f32 %v1108_v60 }
0x1114   :  { %vm856_vm13 = vmor %vm854_vm12, %vm855_vm11 }
0x1115   :  { %v851_v62 = vsub.f32 1.0, %v850_v61 }
0x1117   :  { %v852_v1 = vmul.f32 %v1108_v60, %v851_v62 }
0x1119   :  { %v853_v63 = vadd.f32 %v1108_v60, %v852_v1 }
0x111b   :  { %v857_v4 = vsel %vm856_vm13, %v1108_v60, %v853_v63 }
0x111c   :  { %v862_v5 = vsel %vm859_vm14, %v861_v27, %v857_v4 }
0x111d   :  { %v865_v8 = vmul.f32 %v862_v5, %v818_v7 }
0x117a   :  { %v868_v22 = vpop.permute.xlu0 %867 }
0x117b   :  { %v870_v6 = vmul.f32 %v868_v22, %v862_v5 }
0x117d   :  { %872 = vrot.lane.b32.xlu1 %v870_v6, %s1142_s9 }
0x1182   :  { %v886_v16 = vpop.permute.xlu0 %885 }
0x1183   :  { %vm887_vm15 = vcmp.eq.s32.totalorder %v886_v16, 1 }
0x11ef   :  { %v873_v9 = vpop.permute.xlu1 %872 }
0x11f0   :  { %v875_v10 = vadd.f32 %v873_v9, %v865_v8 }
0x11f2   :  { %1109 = vtanh.f32 %v875_v10 }
0x11f8   :  { %v1110_v11 = vpop.eup %1109 }
0x11f9   :  { %878 = vrot.lane.b32.xlu2 %v1110_v11, %s1141_s26 }
0x1253   :  { %v879_v17 = vpop.permute.xlu2 %878 }
0x1254   :  { %v881_v18 = vmul.f32 %v879_v17, %v862_v5 }
0x1256   :  { %v888_v19 = vsel %vm887_vm15, %v881_v18, %v817_v49 }
0x1257   :  { %896 = vrot.lane.b32.xlu1 %v888_v19, %s1142_s9 }
0x12c9   :  { %v897_v20 = vpop.permute.xlu1 %896 }
0x12ca   :  { %1022 = vmatmul.msk.f32.vlgmr.msrb.gmra.mxu1 %vm215_vm10, %v897_v20 }
0x1347   :  { %v917_v28 = vpop.f32.mrf.mxu1 }
0x1348   :  { %v941_v29 = vadd.f32 %v940_v26, %v917_v28 }
0x134a   :  { %v947_v30 = vadd.f32 %v1039_v25, %v941_v29 }
0x134c   :  { %1111 = vtanh.f32 %v947_v30 }
0x1352   :  { %v1112_v31 = vpop.eup %1111 }
0x1353   :  { %1024 = vmatmul.msk.f32.vlgmr.msra.gmra.mxu0 %vm215_vm10, %v1112_v31 }
0x13d0   :  { %v977_v33 = vpop.f32.mrf.mxu0 }
0x13d1   :  { %v978_v34 = vadd.f32 %v1040_v32, %v977_v33 }
0x13d3   :  { %980 = vst [vmem:[#allocation2] sm:$0xff] %v978_v34 }
0x13d4   :  { %991 = dma.vmem_to_hbm [thread:$0]  %s987_s13, 128, %s989_s24, [#allocation3]  }
0x13d5   :  { %1137 = dma.done.wait [#allocation3], 128  }
0x13d6   :  { %1138 = vsyncadd [#allocation3], 4294967168 }
0x13d7   :  { %996 = vsyncpa [#allocation3], 1 }

</bundles_post_ra>
